<compile_context>
chip_gen: v7x
topology: tpu7x:2x2x1
jax: 0.10.0
libtpu: 0.0.40
codegen_flags: <defaults>
</compile_context>

<pallas_src>
import jax
import jax.numpy as jnp
from jax.experimental import pallas as pl
from jax.experimental.pallas import tpu as pltpu

# ----------------------------- model hyper-parameters -----------------------------
B, S, D = 2, 8, 32          # batch, sequence length, feature_size
H = 4                       # attention heads
DH = D // H                 # per-head dim
D_FF = 64                   # feed-forward hidden
D_ADAPTER = 16              # adapter bottleneck
NUM_LAYERS = 2
NUM_DOMAINS = 2
LN_EPS = 1e-5               # PyTorch nn.LayerNorm default
PAD = D_FF                  # padded width for bias rows / MLP weight slabs (64)


def _layer_norm(v, g, b):
    mu = jnp.mean(v, axis=-1, keepdims=True)
    var = jnp.mean((v - mu) ** 2, axis=-1, keepdims=True)
    return (v - mu) * jax.lax.rsqrt(var + LN_EPS) * g + b


# ------------------------------ fused Pallas kernel --------------------------------
def fused_encoder_kernel(x_ref, mask_ref, ln_ref, bias_ref, qkvw_ref, qkvb_ref,
                         woh_ref, mlp_ref, mem_ref, adapter_ref, x_scr):
    l = pl.program_id(1)

    # layer 0: bring the input activation for this batch element into the resident scratch
    @pl.when(l == 0)
    def _():
        x_scr[...] = x_ref[0]

    x = x_scr[...]                          # [S, D] running activation
    ln = ln_ref[0]                          # [8, D]  ln1_g/b, ln2_g/b, lna_g/b, fin_g/b
    bias = bias_ref[0]                      # [5, PAD] bo, b1, b2, bd, bu (zero-padded)

    # ---- SublayerConnection[0]: x + self_attn(LN(x))  (dropout = identity, eval) ----
    xn = _layer_norm(x, ln[0], ln[1])
    xn_b = jnp.broadcast_to(xn, (H, S, D))                    # broadcast over heads
    qw, kw, vw = qkvw_ref[0, 0], qkvw_ref[0, 1], qkvw_ref[0, 2]   # [H, D, DH]
    qb, kb, vb = qkvb_ref[0, 0], qkvb_ref[0, 1], qkvb_ref[0, 2]   # [H, 1, DH]

    q = jnp.einsum('hsd,hdk->hsk', xn_b, qw, preferred_element_type=jnp.float32) + qb
    k = jnp.einsum('hsd,hdk->hsk', xn_b, kw, preferred_element_type=jnp.float32) + kb
    v = jnp.einsum('hsd,hdk->hsk', xn_b, vw, preferred_element_type=jnp.float32) + vb

    scale = 1.0 / (DH ** 0.5)
    s = jnp.einsum('hqd,hkd->hqk', q, k, preferred_element_type=jnp.float32) * scale
    # mask materialised once ([1,1,S] broadcast over heads and query rows)
    s = jnp.where(mask_ref[...] == 0.0, -1e9, s)
    s = s - jnp.max(s, axis=-1, keepdims=True)
    p = jnp.exp(s)
    p = p * pl.reciprocal(jnp.sum(p, axis=-1, keepdims=True), approx=True)
    ctx = jnp.einsum('hqk,hkd->hqd', p, v, preferred_element_type=jnp.float32)
    # output projection: concat(heads) @ Wo  ==  sum_h ctx_h @ Wo_h
    attn = jnp.einsum('hqd,hdo->hqo', ctx, woh_ref[0],
                      preferred_element_type=jnp.float32)
    attn = jnp.sum(attn, axis=0) + bias[0, :D]
    x1 = x + attn

    # ---- SublayerConnection[1]: x1 + FFN(LN(x1)) ----
    x1n = _layer_norm(x1, ln[2], ln[3])
    w1 = mlp_ref[0, 0][:D, :]               # [D, D_FF]
    w2 = mlp_ref[0, 1][:, :D]               # [D_FF, D]
    hf = jnp.maximum(
        jnp.dot(x1n, w1, preferred_element_type=jnp.float32) + bias[1, :], 0.0)
    x2 = x1 + jnp.dot(hf, w2, preferred_element_type=jnp.float32) + bias[2, :D]

    # ---- domain adapter: x2 + up(relu(down(LN(x2)))) ----
    # TODO(synk): adapter internals (class not given in source) reconstructed as a
    # standard pre-LN ReLU bottleneck adapter; mix_output gating is not reconstructed.
    x2n = _layer_norm(x2, ln[4], ln[5])
    wd = mlp_ref[0, 2][:D, :D_ADAPTER]      # [D, D_ADAPTER]
    wu = mlp_ref[0, 3][:D_ADAPTER, :D]      # [D_ADAPTER, D]
    hd = jnp.maximum(
        jnp.dot(x2n, wd, preferred_element_type=jnp.float32) + bias[3, :D_ADAPTER], 0.0)
    hu = jnp.dot(hd, wu, preferred_element_type=jnp.float32) + bias[4, :D]
    out = x2 + hu

    adapter_ref[0, 0] = hu                  # this layer's adapter_output
    x_scr[...] = out                        # carry activation to the next layer

    # last layer: apply the encoder's final LayerNorm and emit `memory`
    @pl.when(l == pl.num_programs(1) - 1)
    def _():
        mem_ref[0] = _layer_norm(out, ln[6], ln[7])


# ------------------------------- host-side packing ----------------------------------
def _pad1(v, n):
    v = v.reshape(-1)
    return jnp.pad(v, (0, n - v.shape[0]))


def _pad2(w, r, c):
    return jnp.pad(w, ((0, r - w.shape[0]), (0, c - w.shape[1])))


def _split_heads_w(w):                      # [D, D] -> [H, D, DH]
    return jnp.transpose(w.reshape(D, H, DH), (1, 0, 2))


def _split_heads_b(b):                      # [1, D] -> [H, 1, DH]
    return jnp.transpose(b.reshape(1, H, DH), (1, 0, 2))


def build_stacked_params(params, target_domain):
    """Stack per-layer params (target-domain adapter selected) into a few slabs."""
    fin_g = params["final_ln_g"].reshape(-1)
    fin_b = params["final_ln_b"].reshape(-1)
    ln_rows, bias_rows, qkvw_rows, qkvb_rows, woh_rows, mlp_rows = [], [], [], [], [], []
    for i, lp in enumerate(params["layers"]):
        td = target_domain[i] if isinstance(target_domain, list) else target_domain
        ad = lp["adapters"][td]
        ln_rows.append(jnp.stack([
            lp["ln1_g"].reshape(-1), lp["ln1_b"].reshape(-1),
            lp["ln2_g"].reshape(-1), lp["ln2_b"].reshape(-1),
            ad["lna_g"].reshape(-1), ad["lna_b"].reshape(-1),
            fin_g, fin_b]))
        bias_rows.append(jnp.stack([
            _pad1(lp["bo"], PAD), _pad1(lp["b1"], PAD), _pad1(lp["b2"], PAD),
            _pad1(ad["bd"], PAD), _pad1(ad["bu"], PAD)]))
        qkvw_rows.append(jnp.stack([_split_heads_w(lp["wq"]),
                                    _split_heads_w(lp["wk"]),
                                    _split_heads_w(lp["wv"])]))
        qkvb_rows.append(jnp.stack([_split_heads_b(lp["bq"]),
                                    _split_heads_b(lp["bk"]),
                                    _split_heads_b(lp["bv"])]))
        woh_rows.append(lp["wo"].reshape(H, DH, D))
        mlp_rows.append(jnp.stack([
            _pad2(lp["w1"], PAD, PAD), _pad2(lp["w2"], PAD, PAD),
            _pad2(ad["wd"], PAD, PAD), _pad2(ad["wu"], PAD, PAD)]))
    return (jnp.stack(ln_rows), jnp.stack(bias_rows), jnp.stack(qkvw_rows),
            jnp.stack(qkvb_rows), jnp.stack(woh_rows), jnp.stack(mlp_rows))


# ------------------------------------ wrapper ----------------------------------------
def transformer_encoder_with_mix_adapter(x, src_mask, params, target_domain=0,
                                          mix_output=False, used_domain_list=None):
    ln_s, bias_s, qkvw_s, qkvb_s, woh_s, mlp_s = build_stacked_params(params, target_domain)
    n_layers = ln_s.shape[0]

    in_specs = [
        pl.BlockSpec((1, S, D), lambda b, l: (b, 0, 0)),                 # x
        pl.BlockSpec((1, 1, S), lambda b, l: (b, 0, 0)),                 # src_mask
        pl.BlockSpec((1, 8, D), lambda b, l: (l, 0, 0)),                 # LN params
        pl.BlockSpec((1, 5, PAD), lambda b, l: (l, 0, 0)),               # biases
        pl.BlockSpec((1, 3, H, D, DH), lambda b, l: (l, 0, 0, 0, 0)),    # qkv weights
        pl.BlockSpec((1, 3, H, 1, DH), lambda b, l: (l, 0, 0, 0, 0)),    # qkv biases
        pl.BlockSpec((1, H, DH, D), lambda b, l: (l, 0, 0, 0)),          # wo (head-split)
        pl.BlockSpec((1, 4, PAD, PAD), lambda b, l: (l, 0, 0, 0)),       # w1/w2/wd/wu
    ]
    out_specs = (
        pl.BlockSpec((1, S, D), lambda b, l: (b, 0, 0)),                 # memory
        pl.BlockSpec((1, 1, S, D), lambda b, l: (l, b, 0, 0)),           # adapter outs
    )
    out_shape = (
        jax.ShapeDtypeStruct((B, S, D), jnp.float32),
        jax.ShapeDtypeStruct((n_layers, B, S, D), jnp.float32),
    )

    memory, adapter_outs = pl.pallas_call(
        fused_encoder_kernel,
        grid=(B, n_layers),
        in_specs=in_specs,
        out_specs=out_specs,
        out_shape=out_shape,
        scratch_shapes=[pltpu.VMEM((S, D), jnp.float32)],
        compiler_params=pltpu.CompilerParams(
            dimension_semantics=("parallel", "arbitrary")),
    )(x, src_mask, ln_s, bias_s, qkvw_s, qkvb_s, woh_s, mlp_s)

    # TODO(synk): mix_output=True path (mix_layer_logits over used_domain_list) has no
    # given reference implementation and is not reconstructed.
    return {
        "memory": memory,
        "mix_layer_logits": [],
        "layer_adapter_output": [adapter_outs[i] for i in range(n_layers)],
    }


# ----------------------------- parameter init ---------------------------------------
def init_params(key):
    keys = [key]

    def nxt():
        keys[0], sub = jax.random.split(keys[0])
        return sub

    def dense(fan_in, fan_out):
        return 0.02 * jax.random.normal(nxt(), (fan_in, fan_out), dtype=jnp.float32)

    layers = []
    for _ in range(NUM_LAYERS):
        lp = {
            "ln1_g": jnp.ones((1, D), jnp.float32), "ln1_b": jnp.zeros((1, D), jnp.float32),
            "wq": dense(D, D), "bq": jnp.zeros((1, D), jnp.float32),
            "wk": dense(D, D), "bk": jnp.zeros((1, D), jnp.float32),
            "wv": dense(D, D), "bv": jnp.zeros((1, D), jnp.float32),
            "wo": dense(D, D), "bo": jnp.zeros((1, D), jnp.float32),
            "ln2_g": jnp.ones((1, D), jnp.float32), "ln2_b": jnp.zeros((1, D), jnp.float32),
            "w1": dense(D, D_FF), "b1": jnp.zeros((1, D_FF), jnp.float32),
            "w2": dense(D_FF, D), "b2": jnp.zeros((1, D), jnp.float32),
            "adapters": [],
        }
        for _ in range(NUM_DOMAINS):
            lp["adapters"].append({
                "lna_g": jnp.ones((1, D), jnp.float32),
                "lna_b": jnp.zeros((1, D), jnp.float32),
                "wd": dense(D, D_ADAPTER),
                "bd": jnp.zeros((1, D_ADAPTER), jnp.float32),
                "wu": dense(D_ADAPTER, D),
                "bu": jnp.zeros((1, D), jnp.float32),
            })
        layers.append(lp)
    return {
        "layers": layers,
        "final_ln_g": jnp.ones((1, D), jnp.float32),
        "final_ln_b": jnp.zeros((1, D), jnp.float32),
    }


# ----------------------------------- main --------------------------------------------
if __name__ == "__main__":
    key = jax.random.PRNGKey(0)
    kx, kp = jax.random.split(key)
    x = jax.random.normal(kx, (B, S, D), dtype=jnp.float32)
    src_mask = jnp.ones((B, 1, S), dtype=jnp.float32)
    src_mask = src_mask.at[1, 0, S - 2:].set(0.0)   # pad-mask last 2 tokens of batch 1

    params = init_params(kp)
    result = transformer_encoder_with_mix_adapter(
        x, src_mask, params, target_domain=1, mix_output=False, used_domain_list=None)

    jax.block_until_ready(result["memory"])
    for a in result["layer_adapter_output"]:
        jax.block_until_ready(a)

    assert result["memory"].shape == (B, S, D)
    assert len(result["layer_adapter_output"]) == NUM_LAYERS
    assert result["layer_adapter_output"][0].shape == (B, S, D)
    print("KERNEL_OK")
</pallas_src>

<mosaic_0001>
module attributes {stable_mosaic.version = 11 : i64} {
  func.func @fused_encoder_kernel(%arg0: i32, %arg1: i32, %arg2: memref<1x8x32xf32, #tpu.memory_space<vmem>>, %arg3: memref<1x1x8xf32, #tpu.memory_space<vmem>>, %arg4: memref<1x8x32xf32, #tpu.memory_space<vmem>>, %arg5: memref<1x5x64xf32, #tpu.memory_space<vmem>>, %arg6: memref<1x3x4x32x8xf32, #tpu.memory_space<vmem>>, %arg7: memref<1x3x4x1x8xf32, #tpu.memory_space<vmem>>, %arg8: memref<1x4x8x32xf32, #tpu.memory_space<vmem>>, %arg9: memref<1x4x64x64xf32, #tpu.memory_space<vmem>>, %arg10: memref<1x8x32xf32, #tpu.memory_space<vmem>>, %arg11: memref<1x1x8x32xf32, #tpu.memory_space<vmem>>, %arg12: memref<8x32xf32, #tpu.memory_space<vmem>>) attributes {dimension_semantics = [#tpu.dimension_semantics<parallel>, #tpu.dimension_semantics<arbitrary>], iteration_bounds = array<i64: 2, 2>, scalar_prefetch = 0 : i64, scratch_operands = 1 : i64, tpu.core_type = #tpu.core_type<tc>, window_params = [{transform_indices = @transform_0, window_bounds = array<i64: 1, 8, 32>}, {transform_indices = @transform_1, window_bounds = array<i64: 1, 1, 8>}, {transform_indices = @transform_2, window_bounds = array<i64: 1, 8, 32>}, {transform_indices = @transform_3, window_bounds = array<i64: 1, 5, 64>}, {transform_indices = @transform_4, window_bounds = array<i64: 1, 3, 4, 32, 8>}, {transform_indices = @transform_5, window_bounds = array<i64: 1, 3, 4, 1, 8>}, {transform_indices = @transform_6, window_bounds = array<i64: 1, 4, 8, 32>}, {transform_indices = @transform_7, window_bounds = array<i64: 1, 4, 64, 64>}, {transform_indices = @transform_8, window_bounds = array<i64: 1, 8, 32>}, {transform_indices = @transform_9, window_bounds = array<i64: 1, 1, 8, 32>}]} {
    %c0_i32 = arith.constant 0 : i32
    %0 = arith.cmpi eq, %arg1, %c0_i32 : i32
    %1 = arith.extui %0 : i1 to i32
    %c0_i32_0 = arith.constant 0 : i32
    %2 = arith.cmpi ne, %1, %c0_i32_0 : i32
    scf.if %2 {
      %c0_97 = arith.constant 0 : index
      %c0_98 = arith.constant 0 : index
      %c0_99 = arith.constant 0 : index
      %195 = vector.load %arg2[%c0_97, %c0_98, %c0_99] : memref<1x8x32xf32, #tpu.memory_space<vmem>>, vector<1x8x32xf32>
      %196 = vector.shape_cast %195 : vector<1x8x32xf32> to vector<8x32xf32>
      %c0_100 = arith.constant 0 : index
      %c0_101 = arith.constant 0 : index
      %197 = vector.load %arg12[%c0_100, %c0_101] : memref<8x32xf32, #tpu.memory_space<vmem>>, vector<8x32xf32>
      tpu.vector_store %arg12[%c0_100, %c0_101], %196 {strides = array<i32>} : memref<8x32xf32, #tpu.memory_space<vmem>>, vector<8x32xf32>,
    } else {
    }
    %c0 = arith.constant 0 : index
    %c0_1 = arith.constant 0 : index
    %3 = vector.load %arg12[%c0, %c0_1] : memref<8x32xf32, #tpu.memory_space<vmem>>, vector<8x32xf32>
    %c0_2 = arith.constant 0 : index
    %c0_3 = arith.constant 0 : index
    %c0_4 = arith.constant 0 : index
    %4 = vector.load %arg4[%c0_2, %c0_3, %c0_4] : memref<1x8x32xf32, #tpu.memory_space<vmem>>, vector<1x8x32xf32>
    %5 = vector.shape_cast %4 : vector<1x8x32xf32> to vector<8x32xf32>
    %c0_5 = arith.constant 0 : index
    %c0_6 = arith.constant 0 : index
    %c0_7 = arith.constant 0 : index
    %6 = vector.load %arg5[%c0_5, %c0_6, %c0_7] : memref<1x5x64xf32, #tpu.memory_space<vmem>>, vector<1x5x64xf32>
    %7 = vector.shape_cast %6 : vector<1x5x64xf32> to vector<5x64xf32>
    %8 = vector.extract_strided_slice %5 {offsets = [0, 0], sizes = [1, 32], strides = [1, 1]} : vector<8x32xf32> to vector<1x32xf32>
    %9 = vector.shape_cast %8 : vector<1x32xf32> to vector<32xf32>
    %10 = vector.extract_strided_slice %5 {offsets = [1, 0], sizes = [1, 32], strides = [1, 1]} : vector<8x32xf32> to vector<1x32xf32>
    %11 = vector.shape_cast %10 : vector<1x32xf32> to vector<32xf32>
    %cst = arith.constant dense<0.000000e+00> : vector<8xf32>
    %12 = vector.multi_reduction <add>, %3, %cst [1] : vector<8x32xf32> to vector<8xf32>
    %13 = vector.shape_cast %12 : vector<8xf32> to vector<8x1xf32>
    %cst_8 = arith.constant 3.200000e+01 : f32
    %14 = vector.broadcast %cst_8 : f32 to vector<8x1xf32>
    %15 = arith.divf %13, %14 : vector<8x1xf32>
    %16 = vector.broadcast %15 : vector<8x1xf32> to vector<8x32xf32>
    %17 = arith.subf %3, %16 : vector<8x32xf32>
    %18 = arith.mulf %17, %17 : vector<8x32xf32>
    %cst_9 = arith.constant dense<0.000000e+00> : vector<8xf32>
    %19 = vector.multi_reduction <add>, %18, %cst_9 [1] : vector<8x32xf32> to vector<8xf32>
    %20 = vector.shape_cast %19 : vector<8xf32> to vector<8x1xf32>
    %cst_10 = arith.constant 3.200000e+01 : f32
    %21 = vector.broadcast %cst_10 : f32 to vector<8x1xf32>
    %22 = arith.divf %20, %21 : vector<8x1xf32>
    %23 = vector.broadcast %15 : vector<8x1xf32> to vector<8x32xf32>
    %24 = arith.subf %3, %23 : vector<8x32xf32>
    %cst_11 = arith.constant 9.99999974E-6 : f32
    %25 = vector.broadcast %cst_11 : f32 to vector<8x1xf32>
    %26 = arith.addf %22, %25 : vector<8x1xf32>
    %27 = math.rsqrt %26 : vector<8x1xf32>
    %28 = vector.broadcast %27 : vector<8x1xf32> to vector<8x32xf32>
    %29 = arith.mulf %24, %28 : vector<8x32xf32>
    %30 = vector.shape_cast %9 : vector<32xf32> to vector<1x32xf32>
    %31 = vector.broadcast %30 : vector<1x32xf32> to vector<8x32xf32>
    %32 = arith.mulf %29, %31 : vector<8x32xf32>
    %33 = vector.shape_cast %11 : vector<32xf32> to vector<1x32xf32>
    %34 = vector.broadcast %33 : vector<1x32xf32> to vector<8x32xf32>
    %35 = arith.addf %32, %34 : vector<8x32xf32>
    %36 = vector.shape_cast %35 : vector<8x32xf32> to vector<1x8x32xf32>
    %37 = vector.broadcast %36 : vector<1x8x32xf32> to vector<4x8x32xf32>
    %c0_12 = arith.constant 0 : index
    %c0_13 = arith.constant 0 : index
    %c0_14 = arith.constant 0 : index
    %c0_15 = arith.constant 0 : index
    %c0_16 = arith.constant 0 : index
    %38 = vector.load %arg6[%c0_12, %c0_13, %c0_14, %c0_15, %c0_16] : memref<1x3x4x32x8xf32, #tpu.memory_space<vmem>>, vector<1x1x4x32x8xf32>
    %39 = vector.shape_cast %38 : vector<1x1x4x32x8xf32> to vector<4x32x8xf32>
    %c0_17 = arith.constant 0 : index
    %c1 = arith.constant 1 : index
    %c0_18 = arith.constant 0 : index
    %c0_19 = arith.constant 0 : index
    %c0_20 = arith.constant 0 : index
    %40 = vector.load %arg6[%c0_17, %c1, %c0_18, %c0_19, %c0_20] : memref<1x3x4x32x8xf32, #tpu.memory_space<vmem>>, vector<1x1x4x32x8xf32>
    %41 = vector.shape_cast %40 : vector<1x1x4x32x8xf32> to vector<4x32x8xf32>
    %c0_21 = arith.constant 0 : index
    %c2 = arith.constant 2 : index
    %c0_22 = arith.constant 0 : index
    %c0_23 = arith.constant 0 : index
    %c0_24 = arith.constant 0 : index
    %42 = vector.load %arg6[%c0_21, %c2, %c0_22, %c0_23, %c0_24] : memref<1x3x4x32x8xf32, #tpu.memory_space<vmem>>, vector<1x1x4x32x8xf32>
    %43 = vector.shape_cast %42 : vector<1x1x4x32x8xf32> to vector<4x32x8xf32>
    %c0_25 = arith.constant 0 : index
    %c0_26 = arith.constant 0 : index
    %c0_27 = arith.constant 0 : index
    %c0_28 = arith.constant 0 : index
    %c0_29 = arith.constant 0 : index
    %44 = vector.load %arg7[%c0_25, %c0_26, %c0_27, %c0_28, %c0_29] : memref<1x3x4x1x8xf32, #tpu.memory_space<vmem>>, vector<1x1x4x1x8xf32>
    %45 = vector.shape_cast %44 : vector<1x1x4x1x8xf32> to vector<4x1x8xf32>
    %c0_30 = arith.constant 0 : index
    %c1_31 = arith.constant 1 : index
    %c0_32 = arith.constant 0 : index
    %c0_33 = arith.constant 0 : index
    %c0_34 = arith.constant 0 : index
    %46 = vector.load %arg7[%c0_30, %c1_31, %c0_32, %c0_33, %c0_34] : memref<1x3x4x1x8xf32, #tpu.memory_space<vmem>>, vector<1x1x4x1x8xf32>
    %47 = vector.shape_cast %46 : vector<1x1x4x1x8xf32> to vector<4x1x8xf32>
    %c0_35 = arith.constant 0 : index
    %c2_36 = arith.constant 2 : index
    %c0_37 = arith.constant 0 : index
    %c0_38 = arith.constant 0 : index
    %c0_39 = arith.constant 0 : index
    %48 = vector.load %arg7[%c0_35, %c2_36, %c0_37, %c0_38, %c0_39] : memref<1x3x4x1x8xf32, #tpu.memory_space<vmem>>, vector<1x1x4x1x8xf32>
    %49 = vector.shape_cast %48 : vector<1x1x4x1x8xf32> to vector<4x1x8xf32>
    "tpu.trace_start"() <{level = 10 : i32, message = "hsd,hdk->hsk"}> : () -> ()
    %cst_40 = arith.constant dense<0.000000e+00> : vector<4x8x8xf32>
    %50 = tpu.matmul %37, %39, %cst_40 {dimension_numbers = #tpu.dot_dimension_numbers<[2], [1], [1], [2], [0, 0, 0, 1, 1, 2], [0], [0]>} : vector<4x8x32xf32>, vector<4x32x8xf32>, vector<4x8x8xf32> -> vector<4x8x8xf32>
    "tpu.trace_stop"() : () -> ()
    %51 = vector.broadcast %45 : vector<4x1x8xf32> to vector<4x8x8xf32>
    %52 = arith.addf %50, %51 : vector<4x8x8xf32>
    "tpu.trace_start"() <{level = 10 : i32, message = "hsd,hdk->hsk"}> : () -> ()
    %cst_41 = arith.constant dense<0.000000e+00> : vector<4x8x8xf32>
    %53 = tpu.matmul %37, %41, %cst_41 {dimension_numbers = #tpu.dot_dimension_numbers<[2], [1], [1], [2], [0, 0, 0, 1, 1, 2], [0], [0]>} : vector<4x8x32xf32>, vector<4x32x8xf32>, vector<4x8x8xf32> -> vector<4x8x8xf32>
    "tpu.trace_stop"() : () -> ()
    %54 = vector.broadcast %47 : vector<4x1x8xf32> to vector<4x8x8xf32>
    %55 = arith.addf %53, %54 : vector<4x8x8xf32>
    "tpu.trace_start"() <{level = 10 : i32, message = "hsd,hdk->hsk"}> : () -> ()
    %cst_42 = arith.constant dense<0.000000e+00> : vector<4x8x8xf32>
    %56 = tpu.matmul %37, %43, %cst_42 {dimension_numbers = #tpu.dot_dimension_numbers<[2], [1], [1], [2], [0, 0, 0, 1, 1, 2], [0], [0]>} : vector<4x8x32xf32>, vector<4x32x8xf32>, vector<4x8x8xf32> -> vector<4x8x8xf32>
    "tpu.trace_stop"() : () -> ()
    %57 = vector.broadcast %49 : vector<4x1x8xf32> to vector<4x8x8xf32>
    %58 = arith.addf %56, %57 : vector<4x8x8xf32>
    "tpu.trace_start"() <{level = 10 : i32, message = "hqd,hkd->hqk"}> : () -> ()
    %cst_43 = arith.constant dense<0.000000e+00> : vector<4x8x8xf32>
    %59 = tpu.matmul %52, %55, %cst_43 {dimension_numbers = #tpu.dot_dimension_numbers<[2], [2], [1], [1], [0, 0, 0, 1, 1, 1], [0], [0]>} : vector<4x8x8xf32>, vector<4x8x8xf32>, vector<4x8x8xf32> -> vector<4x8x8xf32>
    "tpu.trace_stop"() : () -> ()
    %cst_44 = arith.constant 0.353553385 : f32
    %60 = vector.broadcast %cst_44 : f32 to vector<4x8x8xf32>
    %61 = arith.mulf %59, %60 : vector<4x8x8xf32>
    %c0_45 = arith.constant 0 : index
    %c0_46 = arith.constant 0 : index
    %c0_47 = arith.constant 0 : index
    %62 = vector.load %arg3[%c0_45, %c0_46, %c0_47] : memref<1x1x8xf32, #tpu.memory_space<vmem>>, vector<1x1x8xf32>
    %cst_48 = arith.constant 0.000000e+00 : f32
    %63 = vector.broadcast %cst_48 : f32 to vector<1x1x8xf32>
    %64 = arith.cmpf oeq, %62, %63 : vector<1x1x8xf32>
    %cst_49 = arith.constant -1.000000e+09 : f32
    %65 = vector.shape_cast %64 : vector<1x1x8xi1> to vector<1x1x8xi1>
    %66 = vector.broadcast %65 : vector<1x1x8xi1> to vector<4x8x8xi1>
    %67 = vector.broadcast %cst_49 : f32 to vector<4x8x8xf32>
    %68 = arith.select %66, %67, %61 : vector<4x8x8xi1>, vector<4x8x8xf32>
    %cst_50 = arith.constant dense<0xFF800000> : vector<4x8xf32>
    %69 = vector.multi_reduction <maximumf>, %68, %cst_50 [2] : vector<4x8x8xf32> to vector<4x8xf32>
    %70 = vector.shape_cast %69 : vector<4x8xf32> to vector<4x8x1xf32>
    %71 = vector.broadcast %70 : vector<4x8x1xf32> to vector<4x8x8xf32>
    %72 = arith.subf %68, %71 : vector<4x8x8xf32>
    %73 = math.exp %72 : vector<4x8x8xf32>
    %cst_51 = arith.constant dense<0.000000e+00> : vector<4x8xf32>
    %74 = vector.multi_reduction <add>, %73, %cst_51 [2] : vector<4x8x8xf32> to vector<4x8xf32>
    %75 = vector.shape_cast %74 : vector<4x8xf32> to vector<4x8x1xf32>
    %76 = tpu.reciprocal %75 {approx = true} : vector<4x8x1xf32> -> vector<4x8x1xf32>
    %77 = vector.broadcast %76 : vector<4x8x1xf32> to vector<4x8x8xf32>
    %78 = arith.mulf %73, %77 : vector<4x8x8xf32>
    "tpu.trace_start"() <{level = 10 : i32, message = "hqk,hkd->hqd"}> : () -> ()
    %cst_52 = arith.constant dense<0.000000e+00> : vector<4x8x8xf32>
    %79 = tpu.matmul %78, %58, %cst_52 {dimension_numbers = #tpu.dot_dimension_numbers<[2], [1], [1], [2], [0, 0, 0, 1, 1, 2], [0], [0]>} : vector<4x8x8xf32>, vector<4x8x8xf32>, vector<4x8x8xf32> -> vector<4x8x8xf32>
    "tpu.trace_stop"() : () -> ()
    %c0_53 = arith.constant 0 : index
    %c0_54 = arith.constant 0 : index
    %c0_55 = arith.constant 0 : index
    %c0_56 = arith.constant 0 : index
    %80 = vector.load %arg8[%c0_53, %c0_54, %c0_55, %c0_56] : memref<1x4x8x32xf32, #tpu.memory_space<vmem>>, vector<1x4x8x32xf32>
    %81 = vector.shape_cast %80 : vector<1x4x8x32xf32> to vector<4x8x32xf32>
    "tpu.trace_start"() <{level = 10 : i32, message = "hqd,hdo->hqo"}> : () -> ()
    %cst_57 = arith.constant dense<0.000000e+00> : vector<4x8x32xf32>
    %82 = tpu.matmul %79, %81, %cst_57 {dimension_numbers = #tpu.dot_dimension_numbers<[2], [1], [1], [2], [0, 0, 0, 1, 1, 2], [0], [0]>} : vector<4x8x8xf32>, vector<4x8x32xf32>, vector<4x8x32xf32> -> vector<4x8x32xf32>
    "tpu.trace_stop"() : () -> ()
    %cst_58 = arith.constant dense<0.000000e+00> : vector<8x32xf32>
    %83 = vector.multi_reduction <add>, %82, %cst_58 [0] : vector<4x8x32xf32> to vector<8x32xf32>
    %84 = vector.extract_strided_slice %7 {offsets = [0, 0], sizes = [1, 32], strides = [1, 1]} : vector<5x64xf32> to vector<1x32xf32>
    %85 = vector.shape_cast %84 : vector<1x32xf32> to vector<32xf32>
    %86 = vector.shape_cast %85 : vector<32xf32> to vector<1x32xf32>
    %87 = vector.broadcast %86 : vector<1x32xf32> to vector<8x32xf32>
    %88 = arith.addf %83, %87 : vector<8x32xf32>
    %89 = arith.addf %3, %88 : vector<8x32xf32>
    %90 = vector.extract_strided_slice %5 {offsets = [2, 0], sizes = [1, 32], strides = [1, 1]} : vector<8x32xf32> to vector<1x32xf32>
    %91 = vector.shape_cast %90 : vector<1x32xf32> to vector<32xf32>
    %92 = vector.extract_strided_slice %5 {offsets = [3, 0], sizes = [1, 32], strides = [1, 1]} : vector<8x32xf32> to vector<1x32xf32>
    %93 = vector.shape_cast %92 : vector<1x32xf32> to vector<32xf32>
    %cst_59 = arith.constant dense<0.000000e+00> : vector<8xf32>
    %94 = vector.multi_reduction <add>, %89, %cst_59 [1] : vector<8x32xf32> to vector<8xf32>
    %95 = vector.shape_cast %94 : vector<8xf32> to vector<8x1xf32>
    %cst_60 = arith.constant 3.200000e+01 : f32
    %96 = vector.broadcast %cst_60 : f32 to vector<8x1xf32>
    %97 = arith.divf %95, %96 : vector<8x1xf32>
    %98 = vector.broadcast %97 : vector<8x1xf32> to vector<8x32xf32>
    %99 = arith.subf %89, %98 : vector<8x32xf32>
    %100 = arith.mulf %99, %99 : vector<8x32xf32>
    %cst_61 = arith.constant dense<0.000000e+00> : vector<8xf32>
    %101 = vector.multi_reduction <add>, %100, %cst_61 [1] : vector<8x32xf32> to vector<8xf32>
    %102 = vector.shape_cast %101 : vector<8xf32> to vector<8x1xf32>
    %cst_62 = arith.constant 3.200000e+01 : f32
    %103 = vector.broadcast %cst_62 : f32 to vector<8x1xf32>
    %104 = arith.divf %102, %103 : vector<8x1xf32>
    %105 = vector.broadcast %97 : vector<8x1xf32> to vector<8x32xf32>
    %106 = arith.subf %89, %105 : vector<8x32xf32>
    %cst_63 = arith.constant 9.99999974E-6 : f32
    %107 = vector.broadcast %cst_63 : f32 to vector<8x1xf32>
    %108 = arith.addf %104, %107 : vector<8x1xf32>
    %109 = math.rsqrt %108 : vector<8x1xf32>
    %110 = vector.broadcast %109 : vector<8x1xf32> to vector<8x32xf32>
    %111 = arith.mulf %106, %110 : vector<8x32xf32>
    %112 = vector.shape_cast %91 : vector<32xf32> to vector<1x32xf32>
    %113 = vector.broadcast %112 : vector<1x32xf32> to vector<8x32xf32>
    %114 = arith.mulf %111, %113 : vector<8x32xf32>
    %115 = vector.shape_cast %93 : vector<32xf32> to vector<1x32xf32>
    %116 = vector.broadcast %115 : vector<1x32xf32> to vector<8x32xf32>
    %117 = arith.addf %114, %116 : vector<8x32xf32>
    %c0_64 = arith.constant 0 : index
    %c0_65 = arith.constant 0 : index
    %c0_66 = arith.constant 0 : index
    %c0_67 = arith.constant 0 : index
    %118 = vector.load %arg9[%c0_64, %c0_65, %c0_66, %c0_67] : memref<1x4x64x64xf32, #tpu.memory_space<vmem>>, vector<1x1x64x64xf32>
    %119 = vector.shape_cast %118 : vector<1x1x64x64xf32> to vector<64x64xf32>
    %120 = vector.extract_strided_slice %119 {offsets = [0, 0], sizes = [32, 64], strides = [1, 1]} : vector<64x64xf32> to vector<32x64xf32>
    %c0_68 = arith.constant 0 : index
    %c1_69 = arith.constant 1 : index
    %c0_70 = arith.constant 0 : index
    %c0_71 = arith.constant 0 : index
    %121 = vector.load %arg9[%c0_68, %c1_69, %c0_70, %c0_71] : memref<1x4x64x64xf32, #tpu.memory_space<vmem>>, vector<1x1x64x64xf32>
    %122 = vector.shape_cast %121 : vector<1x1x64x64xf32> to vector<64x64xf32>
    %123 = vector.extract_strided_slice %122 {offsets = [0, 0], sizes = [64, 32], strides = [1, 1]} : vector<64x64xf32> to vector<64x32xf32>
    %cst_72 = arith.constant dense<0.000000e+00> : vector<8x64xf32>
    %124 = tpu.matmul %117, %120, %cst_72 {dimension_numbers = #tpu.dot_dimension_numbers<[1], [0], [0], [1], [0, 0, 1, 1], [], []>} : vector<8x32xf32>, vector<32x64xf32>, vector<8x64xf32> -> vector<8x64xf32>
    %125 = vector.extract_strided_slice %7 {offsets = [1, 0], sizes = [1, 64], strides = [1, 1]} : vector<5x64xf32> to vector<1x64xf32>
    %126 = vector.shape_cast %125 : vector<1x64xf32> to vector<64xf32>
    %127 = vector.shape_cast %126 : vector<64xf32> to vector<1x64xf32>
    %128 = vector.broadcast %127 : vector<1x64xf32> to vector<8x64xf32>
    %129 = arith.addf %124, %128 : vector<8x64xf32>
    %cst_73 = arith.constant 0.000000e+00 : f32
    %130 = vector.broadcast %cst_73 : f32 to vector<8x64xf32>
    %131 = arith.maximumf %129, %130 : vector<8x64xf32>
    %cst_74 = arith.constant dense<0.000000e+00> : vector<8x32xf32>
    %132 = tpu.matmul %131, %123, %cst_74 {dimension_numbers = #tpu.dot_dimension_numbers<[1], [0], [0], [1], [0, 0, 1, 1], [], []>} : vector<8x64xf32>, vector<64x32xf32>, vector<8x32xf32> -> vector<8x32xf32>
    %133 = arith.addf %89, %132 : vector<8x32xf32>
    %134 = vector.extract_strided_slice %7 {offsets = [2, 0], sizes = [1, 32], strides = [1, 1]} : vector<5x64xf32> to vector<1x32xf32>
    %135 = vector.shape_cast %134 : vector<1x32xf32> to vector<32xf32>
    %136 = vector.shape_cast %135 : vector<32xf32> to vector<1x32xf32>
    %137 = vector.broadcast %136 : vector<1x32xf32> to vector<8x32xf32>
    %138 = arith.addf %133, %137 : vector<8x32xf32>
    %139 = vector.extract_strided_slice %5 {offsets = [4, 0], sizes = [1, 32], strides = [1, 1]} : vector<8x32xf32> to vector<1x32xf32>
    %140 = vector.shape_cast %139 : vector<1x32xf32> to vector<32xf32>
    %141 = vector.extract_strided_slice %5 {offsets = [5, 0], sizes = [1, 32], strides = [1, 1]} : vector<8x32xf32> to vector<1x32xf32>
    %142 = vector.shape_cast %141 : vector<1x32xf32> to vector<32xf32>
    %cst_75 = arith.constant dense<0.000000e+00> : vector<8xf32>
    %143 = vector.multi_reduction <add>, %138, %cst_75 [1] : vector<8x32xf32> to vector<8xf32>
    %144 = vector.shape_cast %143 : vector<8xf32> to vector<8x1xf32>
    %cst_76 = arith.constant 3.200000e+01 : f32
    %145 = vector.broadcast %cst_76 : f32 to vector<8x1xf32>
    %146 = arith.divf %144, %145 : vector<8x1xf32>
    %147 = vector.broadcast %146 : vector<8x1xf32> to vector<8x32xf32>
    %148 = arith.subf %138, %147 : vector<8x32xf32>
    %149 = arith.mulf %148, %148 : vector<8x32xf32>
    %cst_77 = arith.constant dense<0.000000e+00> : vector<8xf32>
    %150 = vector.multi_reduction <add>, %149, %cst_77 [1] : vector<8x32xf32> to vector<8xf32>
    %151 = vector.shape_cast %150 : vector<8xf32> to vector<8x1xf32>
    %cst_78 = arith.constant 3.200000e+01 : f32
    %152 = vector.broadcast %cst_78 : f32 to vector<8x1xf32>
    %153 = arith.divf %151, %152 : vector<8x1xf32>
    %154 = vector.broadcast %146 : vector<8x1xf32> to vector<8x32xf32>
    %155 = arith.subf %138, %154 : vector<8x32xf32>
    %cst_79 = arith.constant 9.99999974E-6 : f32
    %156 = vector.broadcast %cst_79 : f32 to vector<8x1xf32>
    %157 = arith.addf %153, %156 : vector<8x1xf32>
    %158 = math.rsqrt %157 : vector<8x1xf32>
    %159 = vector.broadcast %158 : vector<8x1xf32> to vector<8x32xf32>
    %160 = arith.mulf %155, %159 : vector<8x32xf32>
    %161 = vector.shape_cast %140 : vector<32xf32> to vector<1x32xf32>
    %162 = vector.broadcast %161 : vector<1x32xf32> to vector<8x32xf32>
    %163 = arith.mulf %160, %162 : vector<8x32xf32>
    %164 = vector.shape_cast %142 : vector<32xf32> to vector<1x32xf32>
    %165 = vector.broadcast %164 : vector<1x32xf32> to vector<8x32xf32>
    %166 = arith.addf %163, %165 : vector<8x32xf32>
    %c0_80 = arith.constant 0 : index
    %c2_81 = arith.constant 2 : index
    %c0_82 = arith.constant 0 : index
    %c0_83 = arith.constant 0 : index
    %167 = vector.load %arg9[%c0_80, %c2_81, %c0_82, %c0_83] : memref<1x4x64x64xf32, #tpu.memory_space<vmem>>, vector<1x1x64x64xf32>
    %168 = vector.shape_cast %167 : vector<1x1x64x64xf32> to vector<64x64xf32>
    %169 = vector.extract_strided_slice %168 {offsets = [0, 0], sizes = [32, 16], strides = [1, 1]} : vector<64x64xf32> to vector<32x16xf32>
    %c0_84 = arith.constant 0 : index
    %c3 = arith.constant 3 : index
    %c0_85 = arith.constant 0 : index
    %c0_86 = arith.constant 0 : index
    %170 = vector.load %arg9[%c0_84, %c3, %c0_85, %c0_86] : memref<1x4x64x64xf32, #tpu.memory_space<vmem>>, vector<1x1x64x64xf32>
    %171 = vector.shape_cast %170 : vector<1x1x64x64xf32> to vector<64x64xf32>
    %172 = vector.extract_strided_slice %171 {offsets = [0, 0], sizes = [16, 32], strides = [1, 1]} : vector<64x64xf32> to vector<16x32xf32>
    %cst_87 = arith.constant dense<0.000000e+00> : vector<8x16xf32>
    %173 = tpu.matmul %166, %169, %cst_87 {dimension_numbers = #tpu.dot_dimension_numbers<[1], [0], [0], [1], [0, 0, 1, 1], [], []>} : vector<8x32xf32>, vector<32x16xf32>, vector<8x16xf32> -> vector<8x16xf32>
    %174 = vector.extract_strided_slice %7 {offsets = [3, 0], sizes = [1, 16], strides = [1, 1]} : vector<5x64xf32> to vector<1x16xf32>
    %175 = vector.shape_cast %174 : vector<1x16xf32> to vector<16xf32>
    %176 = vector.shape_cast %175 : vector<16xf32> to vector<1x16xf32>
    %177 = vector.broadcast %176 : vector<1x16xf32> to vector<8x16xf32>
    %178 = arith.addf %173, %177 : vector<8x16xf32>
    %cst_88 = arith.constant 0.000000e+00 : f32
    %179 = vector.broadcast %cst_88 : f32 to vector<8x16xf32>
    %180 = arith.maximumf %178, %179 : vector<8x16xf32>
    %cst_89 = arith.constant dense<0.000000e+00> : vector<8x32xf32>
    %181 = tpu.matmul %180, %172, %cst_89 {dimension_numbers = #tpu.dot_dimension_numbers<[1], [0], [0], [1], [0, 0, 1, 1], [], []>} : vector<8x16xf32>, vector<16x32xf32>, vector<8x32xf32> -> vector<8x32xf32>
    %182 = vector.extract_strided_slice %7 {offsets = [4, 0], sizes = [1, 32], strides = [1, 1]} : vector<5x64xf32> to vector<1x32xf32>
    %183 = vector.shape_cast %182 : vector<1x32xf32> to vector<32xf32>
    %184 = vector.shape_cast %183 : vector<32xf32> to vector<1x32xf32>
    %185 = vector.broadcast %184 : vector<1x32xf32> to vector<8x32xf32>
    %186 = arith.addf %181, %185 : vector<8x32xf32>
    %187 = arith.addf %138, %186 : vector<8x32xf32>
    %c0_90 = arith.constant 0 : index
    %c0_91 = arith.constant 0 : index
    %c0_92 = arith.constant 0 : index
    %c0_93 = arith.constant 0 : index
    %188 = vector.load %arg11[%c0_90, %c0_91, %c0_92, %c0_93] : memref<1x1x8x32xf32, #tpu.memory_space<vmem>>, vector<1x1x8x32xf32>
    %189 = vector.shape_cast %188 : vector<1x1x8x32xf32> to vector<8x32xf32>
    %190 = vector.shape_cast %186 : vector<8x32xf32> to vector<1x1x8x32xf32>
    tpu.vector_store %arg11[%c0_90, %c0_91, %c0_92, %c0_93], %190 {strides = array<i32>} : memref<1x1x8x32xf32, #tpu.memory_space<vmem>>, vector<1x1x8x32xf32>,
    %c0_94 = arith.constant 0 : index
    %c0_95 = arith.constant 0 : index
    %191 = vector.load %arg12[%c0_94, %c0_95] : memref<8x32xf32, #tpu.memory_space<vmem>>, vector<8x32xf32>
    tpu.vector_store %arg12[%c0_94, %c0_95], %187 {strides = array<i32>} : memref<8x32xf32, #tpu.memory_space<vmem>>, vector<8x32xf32>,
    %c1_i32 = arith.constant 1 : i32
    %192 = arith.cmpi eq, %arg1, %c1_i32 : i32
    %193 = arith.extui %192 : i1 to i32
    %c0_i32_96 = arith.constant 0 : i32
    %194 = arith.cmpi ne, %193, %c0_i32_96 : i32
    scf.if %194 {
      %195 = vector.extract_strided_slice %5 {offsets = [6, 0], sizes = [1, 32], strides = [1, 1]} : vector<8x32xf32> to vector<1x32xf32>
      %196 = vector.shape_cast %195 : vector<1x32xf32> to vector<32xf32>
      %197 = vector.extract_strided_slice %5 {offsets = [7, 0], sizes = [1, 32], strides = [1, 1]} : vector<8x32xf32> to vector<1x32xf32>
      %198 = vector.shape_cast %197 : vector<1x32xf32> to vector<32xf32>
      %cst_97 = arith.constant dense<0.000000e+00> : vector<8xf32>
      %199 = vector.multi_reduction <add>, %187, %cst_97 [1] : vector<8x32xf32> to vector<8xf32>
      %200 = vector.shape_cast %199 : vector<8xf32> to vector<8x1xf32>
      %cst_98 = arith.constant 3.200000e+01 : f32
      %201 = vector.broadcast %cst_98 : f32 to vector<8x1xf32>
      %202 = arith.divf %200, %201 : vector<8x1xf32>
      %203 = vector.broadcast %202 : vector<8x1xf32> to vector<8x32xf32>
      %204 = arith.subf %187, %203 : vector<8x32xf32>
      %205 = arith.mulf %204, %204 : vector<8x32xf32>
      %cst_99 = arith.constant dense<0.000000e+00> : vector<8xf32>
      %206 = vector.multi_reduction <add>, %205, %cst_99 [1] : vector<8x32xf32> to vector<8xf32>
      %207 = vector.shape_cast %206 : vector<8xf32> to vector<8x1xf32>
      %cst_100 = arith.constant 3.200000e+01 : f32
      %208 = vector.broadcast %cst_100 : f32 to vector<8x1xf32>
      %209 = arith.divf %207, %208 : vector<8x1xf32>
      %210 = vector.broadcast %202 : vector<8x1xf32> to vector<8x32xf32>
      %211 = arith.subf %187, %210 : vector<8x32xf32>
      %cst_101 = arith.constant 9.99999974E-6 : f32
      %212 = vector.broadcast %cst_101 : f32 to vector<8x1xf32>
      %213 = arith.addf %209, %212 : vector<8x1xf32>
      %214 = math.rsqrt %213 : vector<8x1xf32>
      %215 = vector.broadcast %214 : vector<8x1xf32> to vector<8x32xf32>
      %216 = arith.mulf %211, %215 : vector<8x32xf32>
      %217 = vector.shape_cast %196 : vector<32xf32> to vector<1x32xf32>
      %218 = vector.broadcast %217 : vector<1x32xf32> to vector<8x32xf32>
      %219 = arith.mulf %216, %218 : vector<8x32xf32>
      %220 = vector.shape_cast %198 : vector<32xf32> to vector<1x32xf32>
      %221 = vector.broadcast %220 : vector<1x32xf32> to vector<8x32xf32>
      %222 = arith.addf %219, %221 : vector<8x32xf32>
      %c0_102 = arith.constant 0 : index
      %c0_103 = arith.constant 0 : index
      %c0_104 = arith.constant 0 : index
      %223 = vector.load %arg10[%c0_102, %c0_103, %c0_104] : memref<1x8x32xf32, #tpu.memory_space<vmem>>, vector<1x8x32xf32>
      %224 = vector.shape_cast %223 : vector<1x8x32xf32> to vector<8x32xf32>
      %225 = vector.shape_cast %222 : vector<8x32xf32> to vector<1x8x32xf32>
      tpu.vector_store %arg10[%c0_102, %c0_103, %c0_104], %225 {strides = array<i32>} : memref<1x8x32xf32, #tpu.memory_space<vmem>>, vector<1x8x32xf32>,
    } else {
    }
    return
  }
  func.func @transform_0(%arg0: i32, %arg1: i32) -> (i32, i32, i32) {
    %c0_i32 = arith.constant 0 : i32
    %c0_i32_0 = arith.constant 0 : i32
    %c0_i32_1 = arith.constant 0 : i32
    return %arg0, %c0_i32, %c0_i32_0 : i32, i32, i32
  }
  func.func @transform_1(%arg0: i32, %arg1: i32) -> (i32, i32, i32) {
    %c0_i32 = arith.constant 0 : i32
    %c0_i32_0 = arith.constant 0 : i32
    %c0_i32_1 = arith.constant 0 : i32
    return %arg0, %c0_i32, %c0_i32_0 : i32, i32, i32
  }
  func.func @transform_2(%arg0: i32, %arg1: i32) -> (i32, i32, i32) {
    %c0_i32 = arith.constant 0 : i32
    %c0_i32_0 = arith.constant 0 : i32
    %c0_i32_1 = arith.constant 0 : i32
    return %arg1, %c0_i32, %c0_i32_0 : i32, i32, i32
  }
  func.func @transform_3(%arg0: i32, %arg1: i32) -> (i32, i32, i32) {
    %c0_i32 = arith.constant 0 : i32
    %c0_i32_0 = arith.constant 0 : i32
    %c0_i32_1 = arith.constant 0 : i32
    return %arg1, %c0_i32, %c0_i32_0 : i32, i32, i32
  }
  func.func @transform_4(%arg0: i32, %arg1: i32) -> (i32, i32, i32, i32, i32) {
    %c0_i32 = arith.constant 0 : i32
    %c0_i32_0 = arith.constant 0 : i32
    %c0_i32_1 = arith.constant 0 : i32
    %c0_i32_2 = arith.constant 0 : i32
    %c0_i32_3 = arith.constant 0 : i32
    return %arg1, %c0_i32, %c0_i32_0, %c0_i32_1, %c0_i32_2 : i32, i32, i32, i32, i32
  }
  func.func @transform_5(%arg0: i32, %arg1: i32) -> (i32, i32, i32, i32, i32) {
    %c0_i32 = arith.constant 0 : i32
    %c0_i32_0 = arith.constant 0 : i32
    %c0_i32_1 = arith.constant 0 : i32
    %c0_i32_2 = arith.constant 0 : i32
    %c0_i32_3 = arith.constant 0 : i32
    return %arg1, %c0_i32, %c0_i32_0, %c0_i32_1, %c0_i32_2 : i32, i32, i32, i32, i32
  }
  func.func @transform_6(%arg0: i32, %arg1: i32) -> (i32, i32, i32, i32) {
    %c0_i32 = arith.constant 0 : i32
    %c0_i32_0 = arith.constant 0 : i32
    %c0_i32_1 = arith.constant 0 : i32
    %c0_i32_2 = arith.constant 0 : i32
    return %arg1, %c0_i32, %c0_i32_0, %c0_i32_1 : i32, i32, i32, i32
  }
  func.func @transform_7(%arg0: i32, %arg1: i32) -> (i32, i32, i32, i32) {
    %c0_i32 = arith.constant 0 : i32
    %c0_i32_0 = arith.constant 0 : i32
    %c0_i32_1 = arith.constant 0 : i32
    %c0_i32_2 = arith.constant 0 : i32
    return %arg1, %c0_i32, %c0_i32_0, %c0_i32_1 : i32, i32, i32, i32
  }
  func.func @transform_8(%arg0: i32, %arg1: i32) -> (i32, i32, i32) {
    %c0_i32 = arith.constant 0 : i32
    %c0_i32_0 = arith.constant 0 : i32
    %c0_i32_1 = arith.constant 0 : i32
    return %arg0, %c0_i32, %c0_i32_0 : i32, i32, i32
  }
  func.func @transform_9(%arg0: i32, %arg1: i32) -> (i32, i32, i32, i32) {
    %c0_i32 = arith.constant 0 : i32
    %c0_i32_0 = arith.constant 0 : i32
    %c0_i32_1 = arith.constant 0 : i32
    return %arg1, %arg0, %c0_i32, %c0_i32_0 : i32, i32, i32, i32
  }
}

</mosaic_0001>

<bundles_post_ra>
// kernel: tpu_custom_call.1
= control target key start
LH: loop header
LB: loop body
LE: loop exit
PB: predicated region body
PF: predicated region fallthrough
CT: control target
= control target key end

     0   :  { %s4586_s0 = inlined_call_operand.vmem [shape: f32[2,8,32], index: 0, kind: input, shape index: {}]   ;;  %s4587_s1 = inlined_call_operand.vmem [shape: f32[2,1,8], index: 1, kind: input, shape index: {}]   ;;  %s4588_s2 = inlined_call_operand.vmem [shape: f32[2,8,32], index: 2, kind: input, shape index: {}]   ;;  %s4589_s3 = inlined_call_operand.vmem [shape: f32[2,5,64], index: 3, kind: input, shape index: {}]   ;;  %s4590_s4 = inlined_call_operand.vmem [shape: f32[2,3,4,32,8], index: 4, kind: input, shape index: {}]   ;;  %s4591_s5 = inlined_call_operand.vmem [shape: f32[2,3,4,1,8], index: 5, kind: input, shape index: {}]   ;;  %s4592_s6 = inlined_call_operand.vmem [shape: f32[2,4,8,32], index: 6, kind: input, shape index: {}]   ;;  %s4593_s7 = inlined_call_operand.vmem [shape: f32[2,4,64,64], index: 7, kind: input, shape index: {}]   ;;  %s4594_s8 = inlined_call_operand.hbm [shape: f32[2,8,32], index: 8, kind: output, shape index: {0}]   ;;  %s4595_s9 = inlined_call_operand.hbm [shape: f32[2,2,8,32], index: 9, kind: output, shape index: {1}]  }
   0x1   :  { %4618 = sst [smem:[#allocation26_spill]] %s4586_s0 }
   0x2   :  { %4619 = sst [smem:[#allocation27_spill]] %s4588_s2 }
   0x3   :  { %4620 = sst [smem:[#allocation28_spill]] %s4589_s3 }
   0x4   :  { %4621 = sst [smem:[#allocation29_spill]] %s4594_s8 }
   0x5   :  { %4622 = sst [smem:[#allocation30_spill]] %s4595_s9 }
   0x6   :  { %15 = vsyncpa [#allocation4], 0 }
   0x7   :  { %17 = vsyncpa [#allocation4 + $0x1], 0 }
   0x8   :  { %18 = vsyncpa [#allocation6], 0 }
   0x9   :  { %20 = vsyncpa [#allocation6 + $0x1], 0  ;;  %s3996_s30 = smov 0   ;;  %s3998_s10 = smov 0  }
   0xa   :  { %s4000_s11 = smov 0   ;;  %s4002_s12 = smov 0  }
   0xb   :  { %s4004_s13 = smov 0   ;;  %s4006_s14 = smov 0  }
   0xc   :  { %s4008_s15 = smov 0   ;;  %s4010_s16 = smov 0  }
   0xd   :  { %s4012_s17 = smov 0   ;;  %s4014_s18 = smov 0  }
   0xe   :  { %s4016_s19 = smov 0  }
   0xf LB: > { %4623 = sst [smem:[#allocation9_spill]] %s3898_s30  ;;  %s3089_s20 = sadd.s32 4294967295, %s3938_s19   ;;  %s3938_s19 = sphi %s4016_s19, %s26_s19   ;;  %s3934_s18 = sphi %s4014_s18, %s4675_s18   ;;  %s3930_s17 = sphi %s4012_s17, %s4674_s17   ;;  %s3926_s16 = sphi %s4010_s16, %s4673_s16   ;;  %s3922_s15 = sphi %s4008_s15, %s4672_s15   ;;  %s3918_s14 = sphi %s4006_s14, %s4671_s14   ;;  %s3914_s13 = sphi %s4004_s13, %s4670_s13   ;;  %s3910_s12 = sphi %s4002_s12, %s4669_s12   ;;  %s3906_s11 = sphi %s4000_s11, %s4668_s11   ;;  %s3902_s10 = sphi %s3998_s10, %s4667_s10   ;;  %s3898_s30 = sphi %s3996_s30, %s4666_s30  }
  0x10   : > { %4624 = sst [smem:[#allocation10_spill]] %s3902_s10  ;;  %s3090_s21 = sadd.s32 4294967294, %s3938_s19  }
  0x11   : > { %4625 = sst [smem:[#allocation11_spill]] %s3906_s11  ;;  %s35_s22 = sadd.s32 1, %s3930_s17 }
  0x12   : > { %4626 = sst [smem:[#allocation12_spill]] %s3910_s12  ;;  %s38_s23 = sadd.s32 1, %s3934_s18 }
  0x13   : > { %4627 = sst [smem:[#allocation13_spill]] %s3914_s13  ;;  %p36_p0 = scmp.ge.s32.totalorder %s35_s22, 2 }
  0x14   : > { %4628 = sst [smem:[#allocation14_spill]] %s3918_s14  ;;  %s253_s24 = sadd.s32 1, %s3918_s14 }
  0x15   : > { %4629 = sst [smem:[#allocation15_spill]] %s3930_s17  ;;  %p263_p1 = scmp.ne.s32.totalorder %s3918_s14, %s3914_s13 }
  0x16   : > { %4630 = sst [smem:[#allocation16_spill]] %s3934_s18  ;;  %p4058_p2 = scmp.eq.s32.totalorder %s3089_s20, 3 }
  0x17   : > { %4631 = sst [smem:[#allocation17_spill]] %s3938_s19  ;;  %s4677_s22 = smov (%p36_p0, %s35_s22), 0 }
  0x18   : > { %4633 = sst [smem:[#allocation18_spill]] %s4677_s22  ;;  %s4679_s23 = smov (!%p36_p0, %s38_s23), %s3934_s18 }
  0x19   : > { %p4067_p3 = por %p4058_p2, %p263_p1  ;;  %p269_p4 = scmp.ne.s32.totalorder %s3914_s13, %s3910_s12 }
  0x1a   : > { %p40_p5 = scmp.ge.s32.totalorder %s4679_s23, 2  ;;  %p4073_p6 = scmp.eq.s32.totalorder %s3090_s21, 3 }
  0x1b   : > { %s4634_s26 = scalar_select %p4067_p3, 1, 0 }
  0x1c   : > { %s276_s28 = ssub.s32 %s3930_s17, %s4677_s22  ;;  %s281_s29 = sadd.s32 1, %s3906_s11 }
  0x1d   : > { %4635 = sst [smem:[#allocation19_spill]] %s4634_s26  ;;  %s4681_s23 = smov (%p40_p5, %s4679_s23), 0 }
  0x1e   : > { %4637 = sst [smem:[#allocation20_spill]] %s4681_s23  ;;  %p4084_p7 = por %p4073_p6, %p269_p4 }
  0x1f   : > { %p291_p8 = scmp.ne.s32.totalorder %s3906_s11, %s3902_s10  ;;  %s250_s12 = ssub.s32 %s3934_s18, %s4681_s23 }
  0x20   : > { %s4638_s20 = scalar_select %p4084_p7, 1, 0 }
  0x21   : > { %p297_p9 = scmp.ne.s32.totalorder %s3902_s10, %s3898_s30  ;;  %p251_p10 = scmp.eq.s32.totalorder %s250_s12, 0 }
  0x22   : > { %4639 = sst [smem:[#allocation21_spill]] %s4638_s20  ;;  %s278_s21 = sor.u32 %s276_s28, %s250_s12 }
  0x23   : > { %p279_p11 = scmp.eq.s32.totalorder %s278_s21, 0  ;;  %p4096_p12 = por %p291_p8, %p4058_p2 }
  0x24   : > { %s4101_s22 = scalar_select %p251_p10, %s3918_s14, %s253_s24  }
  0x25   : > { %s4640_s9 = scalar_select %p4096_p12, 1, 0 }
  0x26   : > { %4642 = sst [smem:[#allocation23_spill]] %s4101_s22  ;;  %p4108_p13 = por %p297_p9, %p4073_p6 }
  0x27   : > { %4641 = sst [smem:[#allocation22_spill]] %s4640_s9  ;;  %p3093_p0 = scmp.ge.s32.totalorder %s3938_s19, 1 }
  0x28   : > { %s4104_s17 = scalar_select %p279_p11, %s3906_s11, %s281_s29  }
  0x29   : > { %s4644_s8 = scalar_select %p4108_p13, 1, 0 }
  0x2a   : > { %4643 = sst [smem:[#allocation24_spill]] %s4104_s17  ;;  %p374_p1 = scmp.lt.s32.totalorder %s3938_s19, 5 }
  0x2b   : > { %4645 = sst [smem:[#allocation25_spill]] %s4644_s8 }
  0x2c   : > { %p375_p4 = pnand %p3093_p0, %p374_p1 }
  0x2d   : > { %s4604_s12 = sand.u32 (!%p375_p4), 1, %s3914_s13   ;;  %s4605_s24 = sand.u32 (!%p375_p4), 1, %s3902_s10  }
  0x2e   : > { %378 = sbr.rel (%p375_p4) target bundleno = 3442 (0xd72), region = 52  ;;  %s4118_s25 = sshll.u32 (!%p375_p4), %s4604_s12, 3 }
  0x2f   : > { %s4122_s27 = sshll.u32 (!%p375_p4), %s4605_s24, 3  ;;  %p444_p2 = scmp.lt.s32.totalorder (!%p375_p4), %s3926_s16, 1 }
  0x30   : > { %p451_p5 = scmp.lt.s32.totalorder (!%p375_p4), %s3922_s15, 1  ;;  %s4646_s0 = sld [smem:[#allocation26_spill]] (!%p375_p4) }
  0x31   : > { %s4647_s2 = sld [smem:[#allocation27_spill]] (!%p375_p4)  ;;  %s4648_s3 = sld [smem:[#allocation28_spill]] (!%p375_p4) }
  0x32   : > { %s443_s18 = scalar_lea.vmem (!%p375_p4), [#allocation5], %s4122_s27  ;;  %p3104_p6 = scmp.ne.s32.totalorder (!%p375_p4), %s3922_s15, 0 }
  0x35   : > { %s4127_s28 = scalar_select %p444_p2, %s3926_s16, 1 }
  0x36   : > { %s452_s29 = scalar_select %p451_p5, %s3922_s15, 1 }
  0x37   : > { %s3096_s21 = sshll.u32 %s4127_s28, 3  ;;  %vm483_vm0 = vcmask (!%p3104_p6), 261120  }
  0x38   : > { %s447_s17 = scalar_lea.vmem %s4646_s0, %s3096_s21  ;;  %s3097_s24 = sshll.u32 %s452_s29, 3 }
  0x39   : > { %s4141_s30 = scalar_lea.vmem %s4647_s2, %s3097_s24  ;;  %s4146_s9 = scalar_lea.vmem %s4648_s3, %s3097_s24  ;;  %v482_v0 = vld [vmem:[%s447_s17] sm:$0xff] (!%p3104_p6) }
  0x3a   : > { %s3658_s10 = smul.u32 384, %s452_s29  ;;  %s3211_s26 = sshll.u32 %s452_s29, 5  ;;  %484 = vst.msk [vmem:[#allocation2] sm:$0xff] (!%p3104_p6), %vm483_vm0, %v482_v0 }
  0x3b   : > { %s3659_s13 = smul.u32 12, %s452_s29  ;;  %s4151_s22 = scalar_lea.vmem %s4592_s6, %s3211_s26 }
  0x3c   : > { %s4156_s21 = scalar_lea.vmem %s4590_s4, %s3658_s10  ;;  %s3212_s8 = sshll.u32 %s452_s29, 8 }
  0x3d   : > { %s4161_s19 = scalar_lea.vmem %s4591_s5, %s3659_s13  ;;  %s4166_s2 = scalar_lea.vmem %s4593_s7, %s3212_s8 }
  0x3e   : > { %s436_s3 = scalar_lea.vmem [#allocation3], %s4118_s25  ;;  %481 = sbr.rel (%p3104_p6) target bundleno = 69 (0x45), region = 56 }
  0x45 PF: > { %v4171_v1 = vld [vmem:[#allocation2] sm:$0xff]  ;;  %vm488_vm1 = vcmask 261120   ;;  %v514_v9 = vld [vmem:[%s4156_s21 + $0x8] sm:$0xff]  ;;  %v3940_v13 = vmov 0.0|0.0   ;;  %v515_v15 = vld [vmem:[%s4156_s21 + $0x10] sm:$0xff]  ;;  %vm3941_vm2 = vmmov 0   ;;  %v503_v24 = vlaneseq  ;;  %s4649_s10 = scalar_lea.vmem %s4587_s1, %s4127_s28 }
  0x46   : > { %v489_v2 = vsel %vm488_vm1, %v4171_v1, 0.0  ;;  %v513_v8 = vld [vmem:[%s4156_s21] sm:$0xff]  ;;  %v518_v12 = vld [vmem:[%s4156_s21 + $0x28] sm:$0xff]  ;;  %3559 = vmatprep.subr.bf16.mxu0 %v3940_v13  ;;  %3565 = vmatprep.subr.bf16.mxu1 %v3940_v13  ;;  %v516_v16 = vld [vmem:[%s4156_s21 + $0x18] sm:$0xff]  ;;  %v3942_v21 = vmov 0.0   ;;  %vm1492_vm3 = vcmask 64512  }
  0x47   : > { %490 = vadd.xlane.f32.xlu0 %v489_v2  ;;  %v517_v10 = vld [vmem:[%s4156_s21 + $0x20] sm:$0xff]  ;;  %v3560_v11 = vpack.c.bf16 %v514_v9, %v513_v8  ;;  %v519_v17 = vld [vmem:[%s4156_s21 + $0x30] sm:$0xff]  ;;  %v3563_v18 = vpack.c.bf16 %v516_v16, %v515_v15  ;;  %v520_v19 = vld [vmem:[%s4156_s21 + $0x38] sm:$0xff]  ;;  %3327 = vmatprep.mubr.msk.f32.mxu0 %vm3941_vm2, %v3942_v21  ;;  %v4195_v26 = vshrl.u32 %v503_v24, 7  ;;  %vm2572_vm6 = vcmask 523264   ;;  %p3203_p8 = scmp.ne.s32.totalorder %s3922_s15, 1 }
  0x48   : > { %v3566_v14 = vpack.c.bf16 %v518_v12, %v517_v10  ;;  %v3569_v20 = vpack.c.bf16 %v520_v19, %v519_v17  ;;  %3338 = vmatprep.mubr.msk.f32.mxu1 %vm3941_vm2, %v3942_v21  ;;  %v4201_v28 = vld [vmem:[%s4141_s30] sm:$0xff]  ;;  %v522_v35 = vld [vmem:[%s4156_s21 + $0x48] sm:$0xff]  ;;  %v523_v41 = vld [vmem:[%s4156_s21 + $0x50] sm:$0xff]  ;;  %vm2765_vm7 = vcmask 130048  }
  0x49   : > { %3561 = vmatpush3.bf16.msra.mxu0 %v3560_v11  ;;  %v4198_v27 = vsub.s32 0, %v4195_v26  ;;  %v510_v29 = vsub.s32 1, %v4195_v26  ;;  %v521_v32 = vld [vmem:[%s4156_s21 + $0x40] sm:$0xff]  ;;  %v526_v37 = vld [vmem:[%s4156_s21 + $0x68] sm:$0xff]  ;;  %v524_v43 = vld [vmem:[%s4156_s21 + $0x58] sm:$0xff] }
  0x4a   : > { %3567 = vmatpush3.bf16.msra.mxu1 %v3566_v14  ;;  %3562 = vmatprep.subr.bf16.mxu0 %v3940_v13  ;;  %v525_v36 = vld [vmem:[%s4156_s21 + $0x60] sm:$0xff]  ;;  %v3572_v39 = vpack.c.bf16 %v522_v35, %v521_v32  ;;  %v527_v44 = vld [vmem:[%s4156_s21 + $0x70] sm:$0xff]  ;;  %v528_v45 = vld [vmem:[%s4156_s21 + $0x78] sm:$0xff]  ;;  %v3575_v46 = vpack.c.bf16 %v524_v43, %v523_v41 }
  0x4b   : > { %3568 = vmatprep.subr.bf16.mxu1 %v3940_v13  ;;  %v506_v30 = vrot.slane %v4201_v28, %v4198_v27  ;;  %v511_v33 = vrot.slane %v4201_v28, %v510_v29  ;;  %v3578_v40 = vpack.c.bf16 %v526_v37, %v525_v36  ;;  %v3581_v47 = vpack.c.bf16 %v528_v45, %v527_v44  ;;  %v3105_v48 = vld [vmem:[%s4156_s21 + $0x80] sm:$0xff]  ;;  %v3106_v49 = vld [vmem:[%s4156_s21 + $0x88] sm:$0xff]  ;;  %v3107_v54 = vld [vmem:[%s4156_s21 + $0x90] sm:$0xff] }
  0x4c   : > { %v3109_v50 = vld [vmem:[%s4156_s21 + $0xa0] sm:$0xff]  ;;  %v3110_v51 = vld [vmem:[%s4156_s21 + $0xa8] sm:$0xff]  ;;  %v3584_v52 = vpack.c.bf16 %v3106_v49, %v3105_v48  ;;  %v3108_v55 = vld [vmem:[%s4156_s21 + $0x98] sm:$0xff] }
  0x4d   : > { %3564 = vmatpush3.bf16.msra.mxu0 %v3563_v18  ;;  %v3590_v53 = vpack.c.bf16 %v3110_v51, %v3109_v50  ;;  %v3111_v56 = vld [vmem:[%s4156_s21 + $0xb0] sm:$0xff]  ;;  %v3112_v57 = vld [vmem:[%s4156_s21 + $0xb8] sm:$0xff]  ;;  %v3587_v58 = vpack.c.bf16 %v3108_v55, %v3107_v54  ;;  %v3113_v60 = vld [vmem:[%s4156_s21 + $0xc0] sm:$0xff] }
  0x4e   : > { %3570 = vmatpush3.bf16.msra.mxu1 %v3569_v20  ;;  %3571 = vmatprep.subr.bf16.mxu0 %v3940_v13  ;;  %v3593_v59 = vpack.c.bf16 %v3112_v57, %v3111_v56  ;;  %v3114_v61 = vld [vmem:[%s4156_s21 + $0xc8] sm:$0xff]  ;;  %v3117_v62 = vld [vmem:[%s4156_s21 + $0xe0] sm:$0xff]  ;;  %v3123_v16 = vld [vmem:[%s4156_s21 + $0x110] sm:$0xff] }
  0x4f   : > { %3577 = vmatprep.subr.bf16.mxu1 %v3940_v13  ;;  %v3118_v63 = vld [vmem:[%s4156_s21 + $0xe8] sm:$0xff]  ;;  %v3596_v0 = vpack.c.bf16 %v3114_v61, %v3113_v60  ;;  %v3121_v9 = vld [vmem:[%s4156_s21 + $0x100] sm:$0xff]  ;;  %v3124_v17 = vld [vmem:[%s4156_s21 + $0x118] sm:$0xff] }
  0x50   : > { %v3602_v2 = vpack.c.bf16 %v3118_v63, %v3117_v62  ;;  %v3122_v10 = vld [vmem:[%s4156_s21 + $0x108] sm:$0xff]  ;;  %v3125_v11 = vld [vmem:[%s4156_s21 + $0x120] sm:$0xff]  ;;  %v3127_v18 = vld [vmem:[%s4156_s21 + $0x130] sm:$0xff]  ;;  %v3611_v20 = vpack.c.bf16 %v3124_v17, %v3123_v16 }
  0x51   : > { %v3126_v12 = vld [vmem:[%s4156_s21 + $0x128] sm:$0xff]  ;;  %v3608_v14 = vpack.c.bf16 %v3122_v10, %v3121_v9  ;;  %v3128_v19 = vld [vmem:[%s4156_s21 + $0x138] sm:$0xff]  ;;  %v3135_v35 = vld [vmem:[%s4156_s21 + $0x170] sm:$0xff] }
  0x52   : > { %v3614_v15 = vpack.c.bf16 %v3126_v12, %v3125_v11  ;;  %v3130_v24 = vld [vmem:[%s4156_s21 + $0x148] sm:$0xff]  ;;  %v3136_v36 = vld [vmem:[%s4156_s21 + $0x178] sm:$0xff]  ;;  %v3153_v48 = vld [vmem:[%s4161_s19 + $0x4] ss:$0 sm:$0xff] }
  0x53   : > { %v3154_v49 = vld [vmem:[%s4161_s19 + $0x5] ss:$0 sm:$0xff]  ;;  %v3145_v51 = vld [vmem:[%s4161_s19] ss:$0 sm:$0xff]  ;;  %v3156_v60 = vld [vmem:[%s4161_s19 + $0x7] ss:$0 sm:$0xff] }
  0x54   : > { %v3147_v63 = vld [vmem:[%s4161_s19 + $0x2] ss:$0 sm:$0xff]  ;;  %v3162_v9 = vld [vmem:[%s4161_s19 + $0x9] ss:$0 sm:$0xff] }
  0xd4   : > { %v491_v3 = vpop.xlane.xlu0 %490 }
  0xd5   : > { %v493_v4 = vmul.f32 0.03125, %v491_v3  ;;  %v3115_v3 = vld [vmem:[%s4156_s21 + $0xd0] sm:$0xff] }
  0xd7   : > { %v494_v5 = vsub.f32 %v4171_v1, %v493_v4  ;;  %v3116_v4 = vld [vmem:[%s4156_s21 + $0xd8] sm:$0xff] }
  0xd9   : > { %v495_v6 = vmul.f32 %v494_v5, %v494_v5 }
  0xdb   : > { %v496_v7 = vsel %vm488_vm1, %v495_v6, 0.0  ;;  %v3120_v6 = vld [vmem:[%s4156_s21 + $0xf8] sm:$0xff] }
  0xdc   : > { %497 = vadd.xlane.f32.xlu0 %v496_v7  ;;  %v3599_v7 = vpack.c.bf16 %v3116_v4, %v3115_v3 }
 0x169   : > { %v498_v22 = vpop.xlane.xlu0 %497 }
 0x16a   : > { %v499_v23 = vmul.f32 0.03125, %v498_v22  ;;  %v3617_v22 = vpack.c.bf16 %v3128_v19, %v3127_v18 }
 0x16c   : > { %v500_v25 = vadd.f32 1e-05, %v499_v23  ;;  %v3129_v23 = vld [vmem:[%s4156_s21 + $0x140] sm:$0xff] }
 0x16e   : > { %3764 = vrsqrt.f32 %v500_v25  ;;  %v3133_v25 = vld [vmem:[%s4156_s21 + $0x160] sm:$0xff] }
 0x178   : > { %v3765_v31 = vpop.eup %3764 }
 0x179   : > { %v502_v34 = vmul.f32 %v3765_v31, %v494_v5  ;;  %v3119_v5 = vld [vmem:[%s4156_s21 + $0xf0] sm:$0xff]  ;;  %v3620_v31 = vpack.c.bf16 %v3130_v24, %v3129_v23  ;;  %v3943_v23 = vmov 0  }
 0x17a   : > { %v3605_v8 = vpack.c.bf16 %v3120_v6, %v3119_v5 }
 0x17b   : > { %v507_v38 = vmul.f32 %v506_v30, %v502_v34  ;;  %v3134_v30 = vld [vmem:[%s4156_s21 + $0x168] sm:$0xff]  ;;  %v3132_v34 = vld [vmem:[%s4156_s21 + $0x158] sm:$0xff] }
 0x17c   : > { %v3626_v32 = vpack.c.bf16 %v3134_v30, %v3133_v25 }
 0x17d   : > { %v4214_v42 = vadd.f32 %v511_v33, %v507_v38  ;;  %v3131_v33 = vld [vmem:[%s4156_s21 + $0x150] sm:$0xff]  ;;  %v3629_v38 = vpack.c.bf16 %v3136_v36, %v3135_v35 }
 0x17e   : > { %v3623_v37 = vpack.c.bf16 %v3132_v34, %v3131_v33 }
 0x17f   : > { %3328 = vmatmul.mubr.msk.f32.vlgmr.msra.gmra.mrb[0].mxu0 %vm488_vm1, %v4214_v42  ;;  %3339 = vmatmul.mubr.msk.f32.vlgmr.msra.gmra.mrb[0].mxu1 %vm488_vm1, %v4214_v42 }
 0x180   : > { %3573 = vmatpush3.bf16.msra.mxu0 %v3572_v39  ;;  %3579 = vmatpush3.bf16.msra.mxu1 %v3578_v40 }
 0x181   : > { %3574 = vmatprep.subr.bf16.mxu0 %v3940_v13  ;;  %3580 = vmatprep.subr.bf16.mxu1 %v3940_v13 }
 0x182   : > { %3349 = vmatprep.mubr.msk.f32.mxu0 %vm3941_vm2, %v3942_v21  ;;  %3360 = vmatprep.mubr.msk.f32.mxu1 %vm3941_vm2, %v3942_v21 }
 0x184   : > { %3576 = vmatpush3.bf16.msra.mxu0 %v3575_v46  ;;  %3582 = vmatpush3.bf16.msra.mxu1 %v3581_v47 }
 0x185   : > { %3583 = vmatprep.subr.bf16.mxu0 %v3940_v13  ;;  %3589 = vmatprep.subr.bf16.mxu1 %v3940_v13 }
 0x187   : > { %3350 = vmatmul.mubr.msk.f32.vlgmr.msra.gmra.mrb[2].mxu0 %vm488_vm1, %v4214_v42  ;;  %3361 = vmatmul.mubr.msk.f32.vlgmr.msra.gmra.mrb[2].mxu1 %vm488_vm1, %v4214_v42 }
 0x188   : > { %3585 = vmatpush3.bf16.msra.mxu0 %v3584_v52  ;;  %3591 = vmatpush3.bf16.msra.mxu1 %v3590_v53  ;;  %v3146_v52 = vld [vmem:[%s4161_s19 + $0x1] ss:$0 sm:$0xff] }
 0x189   : > { %3586 = vmatprep.subr.bf16.mxu0 %v3940_v13  ;;  %3592 = vmatprep.subr.bf16.mxu1 %v3940_v13 }
 0x18a   : > { %3371 = vmatprep.mubr.msk.f32.mxu0 %vm3941_vm2, %v3942_v21  ;;  %3382 = vmatprep.mubr.msk.f32.mxu1 %vm3941_vm2, %v3942_v21 }
 0x18c   : > { %3588 = vmatpush3.bf16.msra.mxu0 %v3587_v58  ;;  %3594 = vmatpush3.bf16.msra.mxu1 %v3593_v59  ;;  %v3155_v59 = vld [vmem:[%s4161_s19 + $0x6] ss:$0 sm:$0xff] }
 0x18d   : > { %3595 = vmatprep.subr.bf16.mxu0 %v3940_v13  ;;  %3601 = vmatprep.subr.bf16.mxu1 %v3940_v13 }
 0x18f   : > { %3372 = vmatmul.mubr.msk.f32.vlgmr.msra.gmra.mrb[4].mxu0 %vm488_vm1, %v4214_v42  ;;  %3383 = vmatmul.mubr.msk.f32.vlgmr.msra.gmra.mrb[4].mxu1 %vm488_vm1, %v4214_v42 }
 0x190   : > { %3597 = vmatpush3.bf16.msra.mxu0 %v3596_v0  ;;  %3603 = vmatpush3.bf16.msra.mxu1 %v3602_v2  ;;  %v3148_v0 = vld [vmem:[%s4161_s19 + $0x3] ss:$0 sm:$0xff] }
 0x191   : > { %3598 = vmatprep.subr.bf16.mxu0 %v3940_v13  ;;  %3604 = vmatprep.subr.bf16.mxu1 %v3940_v13 }
 0x192   : > { %3393 = vmatprep.mubr.msk.f32.mxu0 %vm3941_vm2, %v3942_v21  ;;  %3404 = vmatprep.mubr.msk.f32.mxu1 %vm3941_vm2, %v3942_v21 }
 0x194   : > { %3600 = vmatpush3.bf16.msra.mxu0 %v3599_v7  ;;  %3606 = vmatpush3.bf16.msra.mxu1 %v3605_v8  ;;  %v3161_v8 = vld [vmem:[%s4161_s19 + $0x8] ss:$0 sm:$0xff] }
 0x195   : > { %3607 = vmatprep.subr.bf16.mxu0 %v3940_v13  ;;  %3613 = vmatprep.subr.bf16.mxu1 %v3940_v13 }
 0x197   : > { %3394 = vmatmul.mubr.msk.f32.vlgmr.msra.gmra.mrb[6].mxu0 %vm488_vm1, %v4214_v42  ;;  %3405 = vmatmul.mubr.msk.f32.vlgmr.msra.gmra.mrb[6].mxu1 %vm488_vm1, %v4214_v42 }
 0x198   : > { %3609 = vmatpush3.bf16.msra.mxu0 %v3608_v14  ;;  %3615 = vmatpush3.bf16.msra.mxu1 %v3614_v15 }
 0x199   : > { %3610 = vmatprep.subr.bf16.mxu0 %v3940_v13  ;;  %3616 = vmatprep.subr.bf16.mxu1 %v3940_v13 }
 0x19a   : > { %3415 = vmatprep.mubr.msk.f32.mxu0 %vm3941_vm2, %v3942_v21  ;;  %3426 = vmatprep.mubr.msk.f32.mxu1 %vm3941_vm2, %v3942_v21 }
 0x19c   : > { %3612 = vmatpush3.bf16.msra.mxu0 %v3611_v20  ;;  %3618 = vmatpush3.bf16.msra.mxu1 %v3617_v22  ;;  %v1801_v22 = vld [vmem:[%s4649_s10] sm:$0x1] }
 0x19d   : > { %3619 = vmatprep.subr.bf16.mxu0 %v3940_v13  ;;  %3625 = vmatprep.subr.bf16.mxu1 %v3940_v13  ;;  %vm1802_vm4 = vcmp.eq.f32.partialorder %v1801_v22, 0.0 }
 0x19e   : > { %v1803_v24 = vsel %vm1802_vm4, 1, %v3943_v23 }
 0x19f   : > { %3416 = vmatmul.mubr.msk.f32.vlgmr.msra.gmra.mrb[8].mxu0 %vm488_vm1, %v4214_v42  ;;  %3427 = vmatmul.mubr.msk.f32.vlgmr.msra.gmra.mrb[8].mxu1 %vm488_vm1, %v4214_v42  ;;  %v1807_v25 = vrot.slane %v1803_v24, %v4198_v27 }
 0x1a0   : > { %3621 = vmatpush3.bf16.msra.mxu0 %v3620_v31  ;;  %3627 = vmatpush3.bf16.msra.mxu1 %v3626_v32  ;;  %v2151_v32 = vld [vmem:[%s4151_s22 + $0x10] sm:$0xff] }
 0x1a1   : > { %3622 = vmatprep.subr.bf16.mxu0 %v3940_v13  ;;  %3628 = vmatprep.subr.bf16.mxu1 %v3940_v13  ;;  %vm4361_vm5 = vcmp.eq.s32.totalorder %v1807_v25, 1 }
 0x1a2   : > { %3437 = vmatprep.mubr.msk.f32.mxu0 %vm3941_vm2, %v3942_v21  ;;  %3448 = vmatprep.mubr.msk.f32.mxu1 %vm3941_vm2, %v3942_v21 }
 0x1a4   : > { %3624 = vmatpush3.bf16.msra.mxu0 %v3623_v37  ;;  %3630 = vmatpush3.bf16.msra.mxu1 %v3629_v38 }
 0x1a5   : > { %3451 = vmatprep.subr.mxu0 %v3942_v21  ;;  %3456 = vmatprep.subr.mxu1 %v3942_v21 }
 0x1a7   : > { %3438 = vmatmul.mubr.msk.f32.vlgmr.msra.gmra.mrb[10].mxu0 %vm488_vm1, %v4214_v42  ;;  %3449 = vmatmul.mubr.msk.f32.vlgmr.msra.gmra.mrb[10].mxu1 %vm488_vm1, %v4214_v42 }
 0x1a8   : > { %3453 = vmatprep.mubr.msk.f32.mxu0 %vm3941_vm2, %v3942_v21  ;;  %3458 = vmatprep.mubr.msk.f32.mxu1 %vm3941_vm2, %v3942_v21 }
 0x252   : > { %v670_v39 = vpop.f32.mrb[0].mxu0  ;;  %v740_v40 = vpop.f32.mrb[0].mxu1 }
 0x253   : > { %v3329_v41 = vpop.f32.mrb[1].mxu0  ;;  %v3340_v43 = vpop.f32.mrb[1].mxu1  ;;  %v671_v57 = vadd.f32 %v3145_v51, %v670_v39  ;;  %v741_v58 = vadd.f32 %v3146_v52, %v740_v40 }
 0x25a   : > { %v810_v44 = vpop.f32.mrb[2].mxu0  ;;  %v880_v45 = vpop.f32.mrb[2].mxu1 }
 0x25b   : > { %v3351_v46 = vpop.f32.mrb[3].mxu0  ;;  %v3362_v47 = vpop.f32.mrb[3].mxu1  ;;  %v811_v6 = vadd.f32 %v3147_v63, %v810_v44  ;;  %v881_v7 = vadd.f32 %v3148_v0, %v880_v45 }
 0x262   : > { %v974_v50 = vpop.f32.mrb[4].mxu0  ;;  %v1044_v42 = vpop.f32.mrb[4].mxu1 }
 0x263   : > { %v975_v53 = vadd.f32 %v3153_v48, %v974_v50  ;;  %v1045_v54 = vadd.f32 %v3154_v49, %v1044_v42  ;;  %v3373_v55 = vpop.f32.mrb[5].mxu0  ;;  %v3384_v56 = vpop.f32.mrb[5].mxu1 }
 0x265   : > { %3452 = vmatpush3.xpose.msk.msra.mxu0 %vm1492_vm3, %v975_v53  ;;  %3457 = vmatpush3.xpose.msk.msra.mxu1 %vm1492_vm3, %v1045_v54 }
 0x266   : > { %3461 = vmatprep.subr.mxu0 %v3942_v21  ;;  %3466 = vmatprep.subr.mxu1 %v3942_v21 }
 0x268   : > { %3454 = vmatmul.mubr.msk.f32.vlgmr.msra.gmra.mrb[12].mxu0 %vm1492_vm3, %v671_v57  ;;  %3459 = vmatmul.mubr.msk.f32.vlgmr.msra.gmra.mrb[12].mxu1 %vm1492_vm3, %v741_v58 }
 0x269   : > { %3463 = vmatprep.mubr.msk.f32.mxu0 %vm3941_vm2, %v3942_v21  ;;  %3468 = vmatprep.mubr.msk.f32.mxu1 %vm3941_vm2, %v3942_v21 }
 0x26a   : > { %v1114_v61 = vpop.f32.mrb[6].mxu0  ;;  %v1184_v62 = vpop.f32.mrb[6].mxu1 }
 0x26b   : > { %v1115_v2 = vadd.f32 %v3155_v59, %v1114_v61  ;;  %v1185_v3 = vadd.f32 %v3156_v60, %v1184_v62  ;;  %v3395_v4 = vpop.f32.mrb[7].mxu0  ;;  %v3406_v5 = vpop.f32.mrb[7].mxu1 }
 0x26d   : > { %3462 = vmatpush3.xpose.msk.msra.mxu0 %vm1492_vm3, %v1115_v2  ;;  %3467 = vmatpush3.xpose.msk.msra.mxu1 %vm1492_vm3, %v1185_v3 }
 0x26e   : > { %3471 = vmatprep.subr.mxu0 %v3942_v21  ;;  %3476 = vmatprep.subr.mxu1 %v3942_v21 }
 0x270   : > { %3464 = vmatmul.mubr.msk.f32.vlgmr.msra.gmra.mrb[14].mxu0 %vm1492_vm3, %v811_v6  ;;  %3469 = vmatmul.mubr.msk.f32.vlgmr.msra.gmra.mrb[14].mxu1 %vm1492_vm3, %v881_v7 }
 0x271   : > { %3473 = vmatprep.mubr.msk.f32.mxu0 %vm3941_vm2, %v3942_v21  ;;  %3478 = vmatprep.mubr.msk.f32.mxu1 %vm3941_vm2, %v3942_v21 }
 0x272   : > { %v1278_v10 = vpop.f32.mrb[8].mxu0  ;;  %v1348_v11 = vpop.f32.mrb[8].mxu1 }
 0x273   : > { %v1279_v12 = vadd.f32 %v3161_v8, %v1278_v10  ;;  %v1349_v14 = vadd.f32 %v3162_v9, %v1348_v11  ;;  %v3417_v15 = vpop.f32.mrb[9].mxu0  ;;  %v3428_v16 = vpop.f32.mrb[9].mxu1 }
 0x275   : > { %3472 = vmatpush3.msra.mxu0 %v1279_v12  ;;  %3477 = vmatpush3.msra.mxu1 %v1349_v14  ;;  %v3163_v12 = vld [vmem:[%s4161_s19 + $0xa] ss:$0 sm:$0xff] }
 0x276   : > { %3481 = vmatprep.subr.mxu0 %v3942_v21  ;;  %3486 = vmatprep.subr.mxu1 %v3942_v21 }
 0x27a   : > { %v4351_v17 = vpop.f32.mrb[10].mxu0  ;;  %v4353_v18 = vpop.f32.mrb[10].mxu1 }
 0x27b   : > { %v3439_v19 = vpop.f32.mrb[11].mxu0  ;;  %v3450_v20 = vpop.f32.mrb[11].mxu1  ;;  %v1419_v16 = vadd.f32 %v3163_v12, %v4351_v17  ;;  %v3188_v12 = vld [vmem:[%s4166_s2 + $0x58] sm:$0xff] }
 0x27c   : > { %v3164_v19 = vld [vmem:[%s4161_s19 + $0xb] ss:$0 sm:$0xff] }
 0x27d   : > { %v1489_v23 = vadd.f32 %v3164_v19, %v4353_v18  ;;  %v2149_v18 = vld [vmem:[%s4151_s22] sm:$0xff] }
 0x33b   : > { %v1565_v30 = vpop.f32.mrb[12].mxu0  ;;  %v1641_v31 = vpop.f32.mrb[12].mxu1 }
 0x33c   : > { %v1797_v33 = vmul.f32 0.35355338, %v1565_v30  ;;  %v1798_v34 = vmul.f32 0.35355338, %v1641_v31  ;;  %v3455_v35 = vpop.f32.mrb[13].mxu0  ;;  %v3460_v36 = vpop.f32.mrb[13].mxu1 }
 0x33d   : > { %v2150_v31 = vld [vmem:[%s4151_s22 + $0x8] sm:$0xff]  ;;  %v2152_v35 = vld [vmem:[%s4151_s22 + $0x18] sm:$0xff] }
 0x33e   : > { %v1809_v37 = vsel %vm4361_vm5, -1e+09, %v1797_v33  ;;  %v1810_v39 = vsel %vm4361_vm5, -1e+09, %v1798_v34 }
 0x33f   : > { %v1813_v38 = vsel %vm1492_vm3, %v1809_v37, -inf  ;;  %v1816_v43 = vsel %vm1492_vm3, %v1810_v39, -inf }
 0x340   : > { %1814 = vmax.xlane.f32.xlu1 %v1813_v38 }
 0x343   : > { %v1717_v40 = vpop.f32.mrb[14].mxu0  ;;  %v1793_v41 = vpop.f32.mrb[14].mxu1 }
 0x344   : > { %v1799_v44 = vmul.f32 0.35355338, %v1717_v40  ;;  %v1800_v45 = vmul.f32 0.35355338, %v1793_v41  ;;  %v3470_v46 = vpop.f32.mrb[15].mxu1  ;;  %1817 = vmax.xlane.f32.xlu1 %v1816_v43  ;;  %v3465_v47 = vpop.f32.mrb[15].mxu0 }
 0x346   : > { %v1812_v48 = vsel %vm4361_vm5, -1e+09, %v1800_v45  ;;  %v1811_v49 = vsel %vm4361_vm5, -1e+09, %v1799_v44 }
 0x347   : > { %v1822_v50 = vsel %vm1492_vm3, %v1812_v48, -inf  ;;  %v1819_v42 = vsel %vm1492_vm3, %v1811_v49, -inf }
 0x348   : > { %1823 = vmax.xlane.f32.xlu1 %v1822_v50  ;;  %1820 = vmax.xlane.f32.xlu0 %v1819_v42  ;;  %v4422_v50 = vld [vmem:[%s4146_s9] sm:$0x1f] }
 0x3cd   : > { %v1815_v51 = vpop.xlane.xlu1 %1814 }
 0x3ce   : > { %v1825_v52 = vsub.f32 %v1809_v37, %v1815_v51 }
 0x3d0   : > { %v1829_v53 = vmul.f32 1.442695, %v1825_v52 }
 0x3d1   : > { %v1818_v54 = vpop.xlane.xlu1 %1817 }
 0x3d2   : > { %3766 = vpow2.f32 %v1829_v53  ;;  %v1826_v55 = vsub.f32 %v1810_v39, %v1818_v54 }
 0x3d4   : > { %v1831_v56 = vmul.f32 1.442695, %v1826_v55 }
 0x3d5   : > { %v1824_v57 = vpop.xlane.xlu1 %1823  ;;  %v1821_v58 = vpop.xlane.xlu0 %1820 }
 0x3d6   : > { %3768 = vpow2.f32 %v1831_v56  ;;  %v1828_v59 = vsub.f32 %v1812_v48, %v1824_v57  ;;  %v1827_v60 = vsub.f32 %v1811_v49, %v1821_v58  ;;  %v2455_v56 = vrot.slane %v4422_v50, %v4198_v27 }
 0x3d8   : > { %v1835_v61 = vmul.f32 1.442695, %v1828_v59  ;;  %v1833_v62 = vmul.f32 1.442695, %v1827_v60 }
 0x3da   : > { %3770 = vpow2.f32 %v1835_v61 }
 0x3db   : > { %3772 = vpow2.f32 %v1833_v62 }
 0x3dc   : > { %v3767_v63 = vpop.eup %3766 }
 0x3dd   : > { %v1837_v0 = vsel %vm1492_vm3, %v3767_v63, 0.0 }
 0x3de   : > { %1838 = vadd.xlane.f32.xlu0 %v1837_v0 }
 0x3e0   : > { %v3769_v2 = vpop.eup %3768 }
 0x3e1   : > { %v1840_v3 = vsel %vm1492_vm3, %v3769_v2, 0.0 }
 0x3e2   : > { %1841 = vadd.xlane.f32.xlu1 %v1840_v3  ;;  %v2481_v3 = vld [vmem:[%s4166_s2] sm:$0xff] }
 0x3e4   : > { %v3771_v4 = vpop.eup %3770 }
 0x3e5   : > { %v3773_v5 = vpop.eup %3772  ;;  %v1846_v6 = vsel %vm1492_vm3, %v3771_v4, 0.0 }
 0x3e6   : > { %1847 = vadd.xlane.f32.xlu1 %v1846_v6  ;;  %v1843_v7 = vsel %vm1492_vm3, %v3773_v5, 0.0  ;;  %v2484_v6 = vld [vmem:[%s4166_s2 + $0x18] sm:$0xff] }
 0x3e7   : > { %1844 = vadd.xlane.f32.xlu0 %v1843_v7 }
 0x46b   : > { %v1839_v8 = vpop.xlane.xlu0 %1838 }
 0x46c   : > { %3774 = vrcp.f32 %v1839_v8  ;;  %v3185_v8 = vld [vmem:[%s4166_s2 + $0x40] sm:$0xff] }
 0x46f   : > { %v1842_v9 = vpop.xlane.xlu1 %1841 }
 0x470   : > { %3776 = vrcp.f32 %v1842_v9  ;;  %v3186_v9 = vld [vmem:[%s4166_s2 + $0x48] sm:$0xff] }
 0x473   : > { %v1848_v10 = vpop.xlane.xlu1 %1847 }
 0x474   : > { %3778 = vrcp.f32 %v1848_v10  ;;  %v1845_v11 = vpop.xlane.xlu0 %1844  ;;  %v3187_v10 = vld [vmem:[%s4166_s2 + $0x50] sm:$0xff] }
 0x475   : > { %3780 = vrcp.f32 %v1845_v11  ;;  %v3638_v11 = vpack.c.bf16 %v3186_v9, %v3185_v8 }
 0x476   : > { %v3775_v14 = vpop.eup %3774 }
 0x477   : > { %v1853_v15 = vmul.f32 %v3775_v14, %v3767_v63  ;;  %v3641_v14 = vpack.c.bf16 %v3188_v12, %v3187_v10 }
 0x479   : > { %3474 = vmatmul.mubr.msk.f32.vlgmr.msra.gmra.mrb[16].mxu0 %vm1492_vm3, %v1853_v15  ;;  %v3189_v15 = vld [vmem:[%s4166_s2 + $0x60] sm:$0xff] }
 0x47a   : > { %v3777_v20 = vpop.eup %3776  ;;  %3482 = vmatpush3.msra.mxu0 %v1419_v16  ;;  %3483 = vmatprep.mubr.msk.f32.mxu0 %vm3941_vm2, %v3942_v21  ;;  %v3190_v16 = vld [vmem:[%s4166_s2 + $0x68] sm:$0xff] }
 0x47b   : > { %v1854_v22 = vmul.f32 %v3777_v20, %v3769_v2  ;;  %3491 = vmatprep.subr.mxu0 %v3942_v21  ;;  %v3644_v19 = vpack.c.bf16 %v3190_v16, %v3189_v15 }
 0x47d   : > { %3479 = vmatmul.mubr.msk.f32.vlgmr.msra.gmra.mrb[16].mxu1 %vm1492_vm3, %v1854_v22 }
 0x47e   : > { %v3779_v24 = vpop.eup %3778  ;;  %3487 = vmatpush3.msra.mxu1 %v1489_v23  ;;  %3488 = vmatprep.mubr.msk.f32.mxu1 %vm3941_vm2, %v3942_v21 }
 0x47f   : > { %v3781_v17 = vpop.eup %3780  ;;  %v1856_v25 = vmul.f32 %v3779_v24, %v3771_v4  ;;  %3496 = vmatprep.subr.mxu1 %v3942_v21  ;;  %v2482_v4 = vld [vmem:[%s4166_s2 + $0x8] sm:$0xff]  ;;  %v2473_v24 = vsub.s32 2, %v4195_v26 }
 0x480   : > { %v1855_v30 = vmul.f32 %v3781_v17, %v3773_v5  ;;  %v3632_v5 = vpack.c.bf16 %v2482_v4, %v2481_v3  ;;  %v2478_v17 = vsub.s32 3, %v4195_v26 }
 0x481   : > { %3489 = vmatmul.mubr.msk.f32.vlgmr.msra.gmra.mrb[18].mxu1 %vm1492_vm3, %v1856_v25  ;;  %v2474_v25 = vrot.slane %v4201_v28, %v2473_v24 }
 0x482   : > { %3484 = vmatmul.mubr.msk.f32.vlgmr.msra.gmra.mrb[18].mxu0 %vm1492_vm3, %v1855_v30  ;;  %3498 = vmatprep.mubr.msk.f32.mxu1 %vm3941_vm2, %v3942_v21 }
 0x483   : > { %3493 = vmatprep.mubr.msk.f32.mxu0 %vm3941_vm2, %v3942_v21  ;;  %3492 = vmatpush3.msra.mxu0 %v2149_v18 }
 0x484   : > { %3501 = vmatprep.subr.mxu0 %v3942_v21  ;;  %3497 = vmatpush3.msra.mxu1 %v2150_v31  ;;  %v2479_v31 = vrot.slane %v4201_v28, %v2478_v17 }
 0x485   : > { %3506 = vmatprep.subr.mxu1 %v3942_v21 }
 0x54c   : > { %v1926_v33 = vpop.f32.mrb[16].mxu0 }
 0x54d   : > { %v3475_v34 = vpop.f32.mrb[17].mxu0  ;;  %3494 = vmatmul.mubr.msk.f32.vlgmr.msra.gmra.mrb[20].mxu0 %vm1492_vm3, %v1926_v33 }
 0x54e   : > { %3502 = vmatpush3.msra.mxu0 %v2151_v32  ;;  %3503 = vmatprep.mubr.msk.f32.mxu0 %vm3941_vm2, %v3942_v21  ;;  %v3191_v34 = vld [vmem:[%s4166_s2 + $0x70] sm:$0xff] }
 0x54f   : > { %3631 = vmatprep.subr.bf16.mxu0 %v3940_v13 }
 0x550   : > { %v1999_v36 = vpop.f32.mrb[16].mxu1 }
 0x551   : > { %v3480_v37 = vpop.f32.mrb[17].mxu1  ;;  %3499 = vmatmul.mubr.msk.f32.vlgmr.msra.gmra.mrb[20].mxu1 %vm1492_vm3, %v1999_v36 }
 0x552   : > { %3507 = vmatpush3.msra.mxu1 %v2152_v35  ;;  %3508 = vmatprep.mubr.msk.f32.mxu1 %vm3941_vm2, %v3942_v21  ;;  %v3192_v35 = vld [vmem:[%s4166_s2 + $0x78] sm:$0xff]  ;;  %v2497_v37 = vrot.slane %v4422_v50, %v510_v29 }
 0x553   : > { %3637 = vmatprep.subr.bf16.mxu1 %v3940_v13  ;;  %v3647_v36 = vpack.c.bf16 %v3192_v35, %v3191_v34 }
 0x554   : > { %v2145_v38 = vpop.f32.mrb[18].mxu1 }
 0x555   : > { %v2072_v39 = vpop.f32.mrb[18].mxu0  ;;  %v3490_v40 = vpop.f32.mrb[19].mxu1  ;;  %3509 = vmatmul.mubr.msk.f32.vlgmr.msra.gmra.mrb[22].mxu1 %vm1492_vm3, %v2145_v38 }
 0x556   : > { %v3485_v41 = vpop.f32.mrb[19].mxu0  ;;  %3504 = vmatmul.mubr.msk.f32.vlgmr.msra.gmra.mrb[22].mxu0 %vm1492_vm3, %v2072_v39  ;;  %3538 = vmatprep.mubr.msk.f32.mxu1 %vm3941_vm2, %v3942_v21 }
 0x557   : > { %3519 = vmatprep.mubr.msk.f32.mxu0 %vm3941_vm2, %v3942_v21  ;;  %3633 = vmatpush3.bf16.msra.mxu0 %v3632_v5 }
 0x558   : > { %3634 = vmatprep.subr.bf16.mxu0 %v3940_v13  ;;  %3639 = vmatpush3.bf16.msra.mxu1 %v3638_v11 }
 0x559   : > { %3640 = vmatprep.subr.bf16.mxu1 %v3940_v13 }
 0x55c   : > { %3642 = vmatpush3.bf16.msra.mxu1 %v3641_v14 }
 0x55d   : > { %3643 = vmatprep.subr.bf16.mxu1 %v3940_v13 }
 0x560   : > { %3645 = vmatpush3.bf16.msra.mxu1 %v3644_v19 }
 0x561   : > { %3646 = vmatprep.subr.bf16.mxu1 %v3940_v13 }
 0x564   : > { %3648 = vmatpush3.bf16.msra.mxu1 %v3647_v36 }
 0x620   : > { %v2222_v43 = vpop.f32.mrb[20].mxu0 }
 0x621   : > { %v3495_v44 = vpop.f32.mrb[21].mxu0  ;;  %v2445_v46 = vsel %vm488_vm1, %v2222_v43, 0.0  ;;  %v2650_v43 = vrot.slane %v4422_v50, %v2473_v24 }
 0x624   : > { %v2295_v45 = vpop.f32.mrb[20].mxu1 }
 0x625   : > { %v2446_v47 = vsel %vm488_vm1, %v2295_v45, 0.0  ;;  %v3500_v48 = vpop.f32.mrb[21].mxu1 }
 0x626   : > { %v2447_v49 = vadd.f32 %v2446_v47, %v2445_v46 }
 0x628   : > { %v2441_v42 = vpop.f32.mrb[22].mxu1 }
 0x629   : > { %v2368_v51 = vpop.f32.mrb[22].mxu0  ;;  %v3510_v52 = vpop.f32.mrb[23].mxu1  ;;  %v2450_v57 = vsel %vm488_vm1, %v2441_v42, 0.0 }
 0x62a   : > { %v2448_v53 = vsel %vm488_vm1, %v2368_v51, 0.0  ;;  %v3505_v54 = vpop.f32.mrb[23].mxu0 }
 0x62b   : > { %v2449_v55 = vadd.f32 %v2448_v53, %v2447_v49  ;;  %v3195_v53 = vld [vmem:[%s4166_s2 + $0x80] sm:$0xff]  ;;  %v3196_v54 = vld [vmem:[%s4166_s2 + $0x88] sm:$0xff] }
 0x62d   : > { %v2451_v58 = vadd.f32 %v2450_v57, %v2449_v55  ;;  %v3650_v55 = vpack.c.bf16 %v3196_v54, %v3195_v53  ;;  %v3198_v57 = vld [vmem:[%s4166_s2 + $0x98] sm:$0xff] }
 0x62f   : > { %v2456_v59 = vadd.f32 %v2455_v56, %v2451_v58  ;;  %v3197_v56 = vld [vmem:[%s4166_s2 + $0x90] sm:$0xff] }
 0x630   : > { %v3653_v58 = vpack.c.bf16 %v3198_v57, %v3197_v56 }
 0x631   : > { %v2457_v60 = vadd.f32 %v2456_v59, %v4171_v1  ;;  %v2483_v1 = vld [vmem:[%s4166_s2 + $0x10] sm:$0xff] }
 0x632   : > { %v3635_v7 = vpack.c.bf16 %v2484_v6, %v2483_v1  ;;  %v3200_v1 = vld [vmem:[%s4166_s2 + $0xc8] sm:$0xff] }
 0x633   : > { %v2458_v61 = vsel %vm488_vm1, %v2457_v60, 0.0 }
 0x634   : > { %2459 = vadd.xlane.f32.xlu0 %v2458_v61  ;;  %3636 = vmatpush3.bf16.msra.mxu0 %v3635_v7  ;;  %v2686_v7 = vrot.slane %v4422_v50, %v2478_v17 }
 0x635   : > { %3649 = vmatprep.subr.bf16.mxu0 %v3940_v13 }
 0x6c1   : > { %v2460_v62 = vpop.xlane.xlu0 %2459 }
 0x6c2   : > { %v2461_v63 = vmul.f32 0.03125, %v2460_v62  ;;  %v2667_v62 = vsub.s32 4, %v4195_v26 }
 0x6c4   : > { %v2462_v0 = vsub.f32 %v2457_v60, %v2461_v63  ;;  %v2672_v63 = vsub.s32 5, %v4195_v26  ;;  %v2764_v12 = vrot.slane %v4422_v50, %v2667_v62 }
 0x6c6   : > { %v2463_v2 = vmul.f32 %v2462_v0, %v2462_v0  ;;  %v2673_v3 = vrot.slane %v4201_v28, %v2672_v63 }
 0x6c8   : > { %v2464_v27 = vsel %vm488_vm1, %v2463_v2, 0.0 }
 0x6c9   : > { %2465 = vadd.xlane.f32.xlu1 %v2464_v27 }
 0x756   : > { %v2466_v20 = vpop.xlane.xlu1 %2465 }
 0x757   : > { %v2467_v22 = vmul.f32 0.03125, %v2466_v20 }
 0x759   : > { %v2468_v23 = vadd.f32 1e-05, %v2467_v22 }
 0x75b   : > { %3782 = vrsqrt.f32 %v2468_v23 }
 0x765   : > { %v3783_v30 = vpop.eup %3782 }
 0x766   : > { %v2470_v18 = vmul.f32 %v3783_v30, %v2462_v0  ;;  %v2668_v0 = vrot.slane %v4201_v28, %v2667_v62 }
 0x768   : > { %v2475_v32 = vmul.f32 %v2474_v25, %v2470_v18  ;;  %v2861_v18 = vsub.s32 (!%p3203_p8), 6, %v4195_v26 }
 0x76a   : > { %v2480_v33 = vadd.f32 %v2479_v31, %v2475_v32  ;;  %v2866_v31 = vsub.s32 (!%p3203_p8), 7, %v4195_v26  ;;  %v2862_v32 = vrot.slane (!%p3203_p8), %v4201_v28, %v2861_v18 }
 0x76c   : > { %3520 = vmatmul.mubr.msk.f32.vlgmr.msra.gmra.mrb[24].mxu0 %vm488_vm1, %v2480_v33  ;;  %v2867_v34 = vrot.slane (!%p3203_p8), %v4201_v28, %v2866_v31 }
 0x76d   : > { %3549 = vmatprep.mubr.msk.f32.mxu0 %vm3941_vm2, %v3942_v21  ;;  %3651 = vmatpush3.bf16.msra.mxu0 %v3650_v55 }
 0x76e   : > { %3652 = vmatprep.subr.bf16.mxu0 %v3940_v13 }
 0x771   : > { %3654 = vmatpush3.bf16.msra.mxu0 %v3653_v58 }
 0x772   : > { %3655 = vmatprep.subr.bf16.mxu0 %v3940_v13  ;;  %v3199_v13 = vld [vmem:[%s4166_s2 + $0xc0] sm:$0xff] }
 0x773   : > { %v3656_v6 = vpack.c.bf16 %v3200_v1, %v3199_v13 }
 0x83f   : > { %v2567_v38 = vpop.f32.mrb[24].mxu0 }
 0x840   : > { %v2568_v39 = vadd.f32 %v2567_v38, %v2497_v37  ;;  %v3521_v40 = vpop.f32.mrb[25].mxu0 }
 0x842   : > { %v2571_v41 = vmax.f32 %v2568_v39, 0.0 }
 0x844   : > { %3539 = vmatmul.mubr.msk.f32.vlgmr.msra.gmra.mrb[24].mxu1 %vm2572_vm6, %v2571_v41 }
 0x917   : > { %v2642_v44 = vpop.f32.mrb[24].mxu1 }
 0x918   : > { %v2646_v45 = vadd.f32 %v2642_v44, %v2457_v60  ;;  %v3540_v46 = vpop.f32.mrb[25].mxu1 }
 0x91a   : > { %v2651_v47 = vadd.f32 %v2650_v43, %v2646_v45 }
 0x91c   : > { %v2652_v48 = vsel %vm488_vm1, %v2651_v47, 0.0 }
 0x91d   : > { %2653 = vadd.xlane.f32.xlu0 %v2652_v48 }
 0x9aa   : > { %v2654_v29 = vpop.xlane.xlu0 %2653 }
 0x9ab   : > { %v2655_v49 = vmul.f32 0.03125, %v2654_v29 }
 0x9ad   : > { %v2656_v42 = vsub.f32 %v2651_v47, %v2655_v49 }
 0x9af   : > { %v2657_v51 = vmul.f32 %v2656_v42, %v2656_v42 }
 0x9b1   : > { %v2658_v52 = vsel %vm488_vm1, %v2657_v51, 0.0 }
 0x9b2   : > { %2659 = vadd.xlane.f32.xlu1 %v2658_v52 }
 0xa3f   : > { %v2660_v59 = vpop.xlane.xlu1 %2659 }
 0xa40   : > { %v2661_v60 = vmul.f32 0.03125, %v2660_v59 }
 0xa42   : > { %v2662_v61 = vadd.f32 1e-05, %v2661_v60 }
 0xa44   : > { %3784 = vrsqrt.f32 %v2662_v61 }
 0xa4e   : > { %v3785_v2 = vpop.eup %3784 }
 0xa4f   : > { %v2664_v27 = vmul.f32 %v3785_v2, %v2656_v42 }
 0xa51   : > { %v2669_v4 = vmul.f32 %v2668_v0, %v2664_v27 }
 0xa53   : > { %v2674_v5 = vadd.f32 %v2673_v3, %v2669_v4 }
 0xa55   : > { %3550 = vmatmul.mubr.msk.f32.vlgmr.msra.gmra.mrb[26].mxu0 %vm488_vm1, %v2674_v5 }
 0xa56   : > { %3556 = vmatprep.mubr.msk.f32.mxu0 %vm3941_vm2, %v3942_v21  ;;  %3657 = vmatpush3.bf16.msra.mxu0 %v3656_v6 }
 0xb28   : > { %v2756_v8 = vpop.f32.mrb[26].mxu0 }
 0xb29   : > { %v2757_v9 = vadd.f32 %v2756_v8, %v2686_v7  ;;  %v3551_v10 = vpop.f32.mrb[27].mxu0 }
 0xb2b   : > { %v2760_v11 = vmax.f32 %v2757_v9, 0.0 }
 0xb2d   : > { %3557 = vmatmul.mubr.msk.f32.vlgmr.msra.gmra.mrb[28].mxu0 %vm2765_vm7, %v2760_v11 }
 0xbff   : > { %2845 = sbr.rel (%p3203_p8) target bundleno = 3391 (0xd3f), region = 60 }
 0xc00   : > { %v2835_v14 = vpop.f32.mrb[28].mxu0 }
 0xc01   : > { %v2836_v15 = vadd.f32 %v2835_v14, %v2764_v12  ;;  %v3558_v16 = vpop.f32.mrb[29].mxu0 }
 0xc03   : > { %v2839_v19 = vadd.f32 %v2836_v15, %v2651_v47  ;;  %2840 = vst.msk [vmem:[%s443_s18] sm:$0xff] %vm488_vm1, %v2836_v15 }
 0xc05   : > { %2841 = vst.msk [vmem:[#allocation2] sm:$0xff] %vm488_vm1, %v2839_v19  ;;  %v2846_v21 = vsel (!%p3203_p8), %vm488_vm1, %v2839_v19, 0.0 }
 0xc06   : > { %2847 = vadd.xlane.f32.xlu0 %v2846_v21 }
 0xc93   : > { %v2848_v20 = vpop.xlane.xlu0 %2847 }
 0xc94   : > { %v2849_v22 = vmul.f32 0.03125, %v2848_v20 }
 0xc96   : > { %v2850_v23 = vsub.f32 %v2839_v19, %v2849_v22 }
 0xc98   : > { %v2851_v50 = vmul.f32 %v2850_v23, %v2850_v23 }
 0xc9a   : > { %v2852_v24 = vsel %vm488_vm1, %v2851_v50, 0.0 }
 0xc9b   : > { %2853 = vadd.xlane.f32.xlu0 %v2852_v24 }
 0xd28   : > { %v2854_v17 = vpop.xlane.xlu0 %2853 }
 0xd29   : > { %v2855_v25 = vmul.f32 0.03125, %v2854_v17 }
 0xd2b   : > { %v2856_v30 = vadd.f32 1e-05, %v2855_v25 }
 0xd2d   : > { %3786 = vrsqrt.f32 %v2856_v30 }
 0xd37   : > { %v3787_v33 = vpop.eup %3786 }
 0xd38   : > { %v2858_v35 = vmul.f32 %v3787_v33, %v2850_v23 }
 0xd3a   : > { %v2863_v36 = vmul.f32 %v2862_v32, %v2858_v35 }
 0xd3c   : > { %v2868_v37 = vadd.f32 %v2867_v34, %v2863_v36 }
 0xd3e   : > { %2869 = vst.msk [vmem:[%s436_s3] sm:$0xff] %vm488_vm1, %v2868_v37 }
 0xd3f PF: > { %s4652_s2 = sld [smem:[#allocation13_spill]]  ;;  %s3206_s13 = sshll.u32 %s3926_s16, 7 }
 0xd40   : > { %s4654_s26 = sld [smem:[#allocation29_spill]]  ;;  %s2889_s29 = sshll.u32 %s436_s3, 4  ;;  %s2890_s29 = int_to_ptr.vmem [resolvable:$true] %s2889_s29 }
 0xd41   : > { %s3788_s12 = scalar_lea.vmem %s2890_s29, 128  ;;  %s3944_s21 = smov [#allocation3]  }
 0xd42   : > { %p3789_p9 = scmp.ne.s32.totalorder %s2890_s29, %s3788_s12  ;;  %s3792_s8 = sshll.u32 %s3944_s21, 4  ;;  %s3793_s8 = int_to_ptr.vmem [resolvable:$false] %s3792_s8 }
 0xd43   : > { %s3794_s11 = scalar_lea.vmem %s3793_s8, 256  ;;  %p3795_p0 = scmp.lt.s32.totalorder %s2890_s29, %s3793_s8 }
 0xd44   : > { %p3790_p10 = pnand %p3789_p9, %p4067_p3  ;;  %p3796_p1 = scmp.lt.s32.totalorder %s3794_s11, %s3788_s12 }
 0xd45   : > { %s4655_s23 = sand.u32 1, %s4652_s2  }
 0xd46   : > { %s4496_s28 = scalar_lea.hbm %s4654_s26, %s3206_s13  ;;  %s2871_s14 = scalar_lea.sflag [#allocation4], %s4655_s23 }
 0xd47   : > { %p3791_p11 = pneg %p3790_p10  ;;  %p3797_p4 = por %p3796_p1, %p3795_p0 }
 0xd49   : > { %p3798_p2 = pnand %p3797_p4, %p3791_p11 }
 0xd4b   : > { %3801 = shalt.err (!%p3798_p2)
}
 0xd4c   : > { %s3802_s3 = scalar_lea.hbm %s4496_s28, 128  ;;  %s3806_s20 = scalar_lea.hbm %s4654_s26, 256 }
 0xd4d   : > { %p3803_p5 = scmp.ne.s32.totalorder %s4496_s28, %s3802_s3  ;;  %p3807_p9 = scmp.lt.u32.totalorder %s4496_s28, %s4654_s26 }
 0xd4e   : > { %p3808_p10 = scmp.lt.u32.totalorder %s3806_s20, %s3802_s3  ;;  %p3810_p0 = scmp.lt.u32.totalorder %s3802_s3, %s4496_s28 }
 0xd4f   : > { %p3804_p6 = pnand %p3803_p5, %p4067_p3 }
 0xd50   : > { %p3809_p11 = por %p3808_p10, %p3807_p9 }
 0xd51   : > { %p3805_p8 = pneg %p3804_p6 }
 0xd52   : > { %p3811_p1 = por %p3810_p0, %p3809_p11 }
 0xd54   : > { %p3812_p4 = pnand %p3811_p1, %p3805_p8 }
 0xd56   : > { %3815 = shalt.err (!%p3812_p4)
}
 0xd57   : > { %s4656_s30 = sld [smem:[#allocation10_spill]]  ;;  %s3207_s2 = sshll.u32 %s3922_s15, 1 }
 0xd58   : > { %3660 = dma.vmem_to_hbm [thread:$0]  (%p4067_p3), %s2890_s29, 128, %s4496_s28, %s2871_s14  }
 0xd59   : > { %s2904_s13 = sshll.u32 %s443_s18, 4  ;;  %s2900_s17 = sadd.s32 %s3926_s16, %s3207_s2  ;;  %s4523_s13 = int_to_ptr.vmem [resolvable:$true] %s2904_s13 }
 0xd5a   : > { %s3208_s22 = sshll.u32 %s2900_s17, 7  ;;  %s4658_s9 = sld [smem:[#allocation30_spill]] }
 0xd5b   : > { %s3816_s3 = scalar_lea.vmem %s4523_s13, 128  ;;  %s3945_s15 = smov [#allocation5]  }
 0xd5c   : > { %p3817_p2 = scmp.ne.s32.totalorder %s4523_s13, %s3816_s3  ;;  %s3820_s27 = sshll.u32 %s3945_s15, 4  ;;  %s3821_s27 = int_to_ptr.vmem [resolvable:$false] %s3820_s27 }
 0xd5d   : > { %s4659_s8 = sand.u32 1, %s4656_s30   ;;  %s3822_s16 = scalar_lea.vmem %s3821_s27, 256 }
 0xd5e   : > { %s2876_s11 = scalar_lea.sflag [#allocation6], %s4659_s8  ;;  %p3818_p3 = pnand %p3817_p2, %p4096_p12 }
 0xd5f   : > { %p3823_p6 = scmp.lt.s32.totalorder %s4523_s13, %s3821_s27  ;;  %p3824_p8 = scmp.lt.s32.totalorder %s3822_s16, %s3816_s3 }
 0xd60   : > { %s2902_s21 = scalar_lea.hbm %s4658_s9, %s3208_s22  ;;  %p3819_p5 = pneg %p3818_p3 }
 0xd61   : > { %p3825_p9 = por %p3824_p8, %p3823_p6 }
 0xd63   : > { %p3826_p10 = pnand %p3825_p9, %p3819_p5 }
 0xd65   : > { %3829 = shalt.err (!%p3826_p10)
}
 0xd66   : > { %s3830_s18 = scalar_lea.hbm %s2902_s21, 128  ;;  %s3834_s14 = scalar_lea.hbm %s4658_s9, 512 }
 0xd67   : > { %p3831_p11 = scmp.ne.s32.totalorder %s2902_s21, %s3830_s18  ;;  %p3835_p4 = scmp.lt.u32.totalorder %s2902_s21, %s4658_s9 }
 0xd68   : > { %p3836_p2 = scmp.lt.u32.totalorder %s3834_s14, %s3830_s18  ;;  %p3838_p13 = scmp.lt.u32.totalorder %s3830_s18, %s2902_s21 }
 0xd69   : > { %p3832_p0 = pnand %p3831_p11, %p4096_p12 }
 0xd6a   : > { %p3837_p3 = por %p3836_p2, %p3835_p4 }
 0xd6b   : > { %p3833_p1 = pneg %p3832_p0 }
 0xd6c   : > { %p3839_p6 = por %p3838_p13, %p3837_p3 }
 0xd6e   : > { %p3840_p5 = pnand %p3839_p6, %p3833_p1 }
 0xd70   : > { %3843 = shalt.err (!%p3840_p5)
}
 0xd71   : > { %3661 = dma.vmem_to_hbm [thread:$0]  (%p4096_p12), %s4523_s13, 128, %s2902_s21, %s2876_s11  }
 0xd72 PF: > { %s4660_s20 = sld [smem:[#allocation17_spill]]  ;;  %s4661_s24 = sld [smem:[#allocation12_spill]] }
 0xd78   : > { %p3671_p8 = scmp.ge.s32.totalorder %s4660_s20, 2  ;;  %s2916_s30 = sand.u32 1, %s4661_s24  }
 0xd79   : > { %s2917_s2 = scalar_lea.sflag [#allocation4], %s2916_s30 }
 0xd7a   : > { %p3665_p9 = pnand %p3671_p8, %p4084_p7 }
 0xd7c   : > { %3889 = dma.done.wait (!%p3665_p9), %s2917_s2, 128  }
 0xd7d   : > { %3891 = vsyncadd (!%p3665_p9), %s2917_s2, 4294967168  ;;  %s4663_s17 = sld [smem:[#allocation9_spill]]  ;;  %s4664_s22 = sld [smem:[#allocation25_spill]] }
 0xd83   : > { %s2925_s23 = sand.u32 1, %s4663_s17   ;;  %p4665_p13 = scmp.ne.s32.totalorder %s4664_s22, 0 }
 0xd84   : > { %s2926_s12 = scalar_lea.sflag [#allocation6], %s2925_s23 }
 0xd85   : > { %p3668_p10 = pnand %p3671_p8, %p4665_p13 }
 0xd87   : > { %3893 = dma.done.wait (!%p3668_p10), %s2926_s12, 128  }
 0xd88   : > { %3895 = vsyncadd (!%p3668_p10), %s2926_s12, 4294967168  ;;  %s26_s19 = sadd.s32 1, %s4660_s20   ;;  %s4666_s30 = sld [smem:[#allocation10_spill]] }
 0xd89   : > { %p23_p12 = scmp.ge.s32.totalorder %s26_s19, 6   ;;  %s4667_s10 = sld [smem:[#allocation11_spill]] }
 0xd8a   : > { %s4668_s11 = sld [smem:[#allocation24_spill]]  ;;  %s4669_s12 = sld [smem:[#allocation13_spill]] }
 0xd8b   : > { %s4670_s13 = sld [smem:[#allocation14_spill]]  ;;  %s4671_s14 = sld [smem:[#allocation23_spill]] }
 0xd8c   : > { %s4672_s15 = sld [smem:[#allocation15_spill]]  ;;  %s4673_s16 = sld [smem:[#allocation16_spill]] }
 0xd8d   : > { %s4674_s17 = sld [smem:[#allocation18_spill]]  ;;  %s4675_s18 = sld [smem:[#allocation20_spill]] }
 0xd8e   :  { %25 = sbr.rel (!%p23_p12) target bundleno = 15 (0xf), region = 140 }
 0xd95   :  { %2931 = vsyncpa [#allocation4], 1 }
 0xd96   :  { %2933 = vsyncpa [#allocation4 + $0x1], 1 }
 0xd97   :  { %2934 = vsyncpa [#allocation6], 1 }
 0xd98   :  { %2936 = vsyncpa [#allocation6 + $0x1], 1 }

</bundles_post_ra>
